<compile_context>
chip_gen: v7x
topology: tpu7x:2x2x1
jax: 0.10.0
libtpu: 0.0.40
codegen_flags: <defaults>
</compile_context>

<pallas_src>
import functools

import numpy as np
import jax
import jax.numpy as jnp
from jax import lax
from jax.experimental import pallas as pl
from jax.experimental.pallas import tpu as pltpu

STATE_DIM = 24
HIDDEN = 72
HIDDEN_PAD = 128          # lane-aligned padded hidden width for gate blocks
ACTION_DIM = 4
LN_EPS = 1e-5


# ----------------------------- Pallas kernel ------------------------------ #
def actor_kernel(x_ref, wemb_ref, bemb_ref, gamma_ref, beta_ref,
                 wih_ref, bih_ref, whh_f_ref,
                 wfc_ref, bfc_ref,
                 out_ref, *, T, BP):
    HP = HIDDEN_PAD
    G = 4 * HP                                                   # 512

    # ---- embedding: Linear + LayerNorm + Tanh over all T*BP rows at once ----
    e = jnp.dot(x_ref[...], wemb_ref[...],
                preferred_element_type=jnp.float32)              # (T*BP, 72)
    e = e + bemb_ref[...]                                        # (1,72) bcast, once
    # one-pass moments: E[x] and E[x^2] (no reduce->subtract->reduce chain)
    mu = jnp.mean(e, axis=-1, keepdims=True)
    m2 = jnp.mean(e * e, axis=-1, keepdims=True)
    e = (e - mu) * lax.rsqrt((m2 - mu * mu) + LN_EPS)
    e = jnp.tanh(e * gamma_ref[...] + beta_ref[...])             # (T*BP, 72)

    # ---- input-side gate pre-activations, BOTH directions, one MXU call ----
    # packed layout per direction: columns [k*128, k*128+72) hold gate k in
    # (i,f,g,o) order; i/f/o columns pre-scaled by 0.5; padded lanes are zero.
    pre_all = (jnp.dot(e, wih_ref[...], preferred_element_type=jnp.float32)
               + bih_ref[...])                                   # (T*BP, 1024)
    pre_f = pre_all[:, :G]                                       # (T*BP, 512)  forward
    pre_r = pre_all[(T - 1) * BP:, G:]                           # (BP, 512)    reverse @ t=T-1

    def gates_from(pre):
        # ONE tanh over the whole gate row; i/f/o were half-scaled host-side so
        # sigmoid(x) = 0.5*tanh(x/2) + 0.5 is a VPU fma on those blocks.
        t = jnp.tanh(pre)
        i = 0.5 * t[:, 0 * HP:1 * HP] + 0.5
        f = 0.5 * t[:, 1 * HP:2 * HP] + 0.5
        g = t[:, 2 * HP:3 * HP]
        o = 0.5 * t[:, 3 * HP:4 * HP] + 0.5
        return i, f, g, o

    # ---- reverse direction: single cell step from zero state (exact) ----
    # h0 = c0 = 0 -> no recurrent matmul, no forget-gate contribution.
    i_r, _, g_r, o_r = gates_from(pre_r)
    h_rev = o_r * jnp.tanh(i_r * g_r)                            # (BP,128), pad lanes 0

    # ---- forward direction: unrolled scan, one recurrent matmul per step ----
    # TODO(synk): optionally keep whh resident in MXU weight regs across the 7
    # dependent steps via pltpu.matmul_push_rhs/matmul_acc_lhs/matmul_pop.
    whh = whh_f_ref[...]                                         # (128, 512)
    # t = 0: h == 0, so skip the recurrent matmul entirely.
    i0, _, g0, o0 = gates_from(pre_f[0:BP, :])
    c = i0 * g0
    h = o0 * jnp.tanh(c)
    for t in range(1, T):                                        # static unroll (T=8)
        gates = pre_f[t * BP:(t + 1) * BP, :] + jnp.dot(
            h, whh, preferred_element_type=jnp.float32)
        i, f, g, o = gates_from(gates)
        c = f * c + i * g
        h = o * jnp.tanh(c)
    # padded lanes stay exactly 0 through the recurrence (zero weight rows/cols).

    # ---- NormalizedLSTM pooling + Actor head ----
    s = 0.5 * (h + h_rev)                                        # (BP, 128)
    act = jnp.tanh(jnp.dot(s, wfc_ref[...], preferred_element_type=jnp.float32)
                   + bfc_ref[...])
    out_ref[...] = act.astype(out_ref.dtype)


# ------------------------------- wrapper ----------------------------------- #
def actor_forward(x_tm, pk):
    """x_tm: time-major input (T, B, state_dim), float32. pk: packed params."""
    T, B, D = x_tm.shape
    A = pk["w_fc"].shape[1]
    BP = ((B + 7) // 8) * 8            # sublane-pad the batch -> tile-aligned slices
    x_pad = jnp.zeros((T, BP, D), x_tm.dtype).at[:, :B, :].set(x_tm)
    x_2d = x_pad.reshape(T * BP, D)    # wrapper-side layout plumbing (free)
    args = [x_2d, pk["w_emb"], pk["b_emb"], pk["gamma"], pk["beta"],
            pk["wih_both"], pk["b_both"], pk["whh_f"],
            pk["w_fc"], pk["b_fc"]]
    kernel = functools.partial(actor_kernel, T=T, BP=BP)
    out = pl.pallas_call(
        kernel,
        out_shape=jax.ShapeDtypeStruct((BP, A), jnp.float32),
        in_specs=[pl.BlockSpec(memory_space=pltpu.MemorySpace.VMEM)] * len(args),
        out_specs=pl.BlockSpec(memory_space=pltpu.MemorySpace.VMEM),
    )(*args)
    return out[:B]


# -------------------------- parameter construction ------------------------- #
def init_params(key, state_dim=STATE_DIM, hidden=HIDDEN, action_dim=ACTION_DIM):
    ks = jax.random.split(key, 10)
    # embedding Linear: xavier_uniform with tanh gain (5/3), zero bias
    gain = 5.0 / 3.0
    be = gain * np.sqrt(6.0 / (state_dim + hidden))
    w_emb = jax.random.uniform(ks[0], (state_dim, hidden), jnp.float32, -be, be)
    b_emb = jnp.zeros((1, hidden), jnp.float32)
    # LayerNorm default init
    gamma = jnp.ones((1, hidden), jnp.float32)
    beta = jnp.zeros((1, hidden), jnp.float32)
    # LSTM params: default U(-1/sqrt(H), 1/sqrt(H)); bias_hh filled with -0.1
    k = 1.0 / np.sqrt(hidden)
    def lstm_dir(k0, k1, k2):
        wih = jax.random.uniform(k0, (4, hidden, hidden), jnp.float32, -k, k)
        whh = jax.random.uniform(k1, (4, hidden, hidden), jnp.float32, -k, k)
        bih = jax.random.uniform(k2, (4, hidden), jnp.float32, -k, k)
        bhh = jnp.full((4, hidden), -0.1, jnp.float32)
        return wih, whh, bih + bhh
    wih_f, whh_f, b_f = lstm_dir(ks[1], ks[2], ks[3])
    wih_r, whh_r, b_r = lstm_dir(ks[4], ks[5], ks[6])
    # fc head: U(-0.003, 0.003), zero bias
    w_fc = jax.random.uniform(ks[7], (hidden, action_dim), jnp.float32, -0.003, 0.003)
    b_fc = jnp.zeros((1, action_dim), jnp.float32)
    return dict(w_emb=w_emb, b_emb=b_emb, gamma=gamma, beta=beta,
                wih_f=wih_f, whh_f=whh_f, b_f=b_f,
                wih_r=wih_r, whh_r=whh_r, b_r=b_r,
                w_fc=w_fc, b_fc=b_fc)


def pack_params(p, hidden=HIDDEN, hidden_pad=HIDDEN_PAD):
    """Fuse + lane-pad LSTM gate weights for the kernel (done once, host-side).

    Gate blocks (i,f,g,o) are concatenated along the output axis; each block is
    zero-padded 72->128 lanes, and the i/f/o blocks (weights AND biases) are
    pre-scaled by 0.5 so the kernel recovers sigmoid from a single fused tanh
    (sigmoid(x) = 0.5*tanh(x/2) + 0.5).  Forward and reverse input-side weights
    are packed side by side into one (72, 1024) matrix for a single MXU call.
    """
    H, HP = hidden, hidden_pad
    GATE_SCALE = (0.5, 0.5, 1.0, 0.5)        # i, f, g, o

    def pack_cols(w):                        # (4, in, H) -> (in, 4*HP)
        w = np.asarray(w, np.float32)
        out = np.zeros((w.shape[1], 4 * HP), np.float32)
        for k in range(4):
            out[:, k * HP:k * HP + H] = GATE_SCALE[k] * w[k]
        return out

    def pack_bias(b):                        # (4, H) -> (1, 4*HP)
        b = np.asarray(b, np.float32)
        out = np.zeros((1, 4 * HP), np.float32)
        for k in range(4):
            out[0, k * HP:k * HP + H] = GATE_SCALE[k] * b[k]
        return out

    def pad_rows(w):                         # (H, n) -> (HP, n), zero-padded rows
        w = np.asarray(w, np.float32)
        out = np.zeros((HP, w.shape[1]), np.float32)
        out[:H] = w
        return out

    wih_both = np.concatenate([pack_cols(p["wih_f"]), pack_cols(p["wih_r"])], axis=1)
    b_both = np.concatenate([pack_bias(p["b_f"]), pack_bias(p["b_r"])], axis=1)

    return dict(
        w_emb=p["w_emb"], b_emb=p["b_emb"], gamma=p["gamma"], beta=p["beta"],
        wih_both=jnp.asarray(wih_both),                      # (72, 1024)  fwd|rev
        b_both=jnp.asarray(b_both),                          # (1, 1024)
        whh_f=jnp.asarray(pad_rows(pack_cols(p["whh_f"]))),  # (128, 512)  (whh_r unused)
        w_fc=jnp.asarray(pad_rows(p["w_fc"])),               # (128, 4)
        b_fc=p["b_fc"],
    )


# ---------------------------- pure-JAX reference --------------------------- #
def actor_ref(x_tm, p):
    T, B, D = x_tm.shape
    H = p["w_emb"].shape[1]
    e = jnp.einsum("tbd,dh->tbh", x_tm, p["w_emb"]) + p["b_emb"]
    mu = e.mean(-1, keepdims=True)
    var = ((e - mu) ** 2).mean(-1, keepdims=True)
    e = jnp.tanh((e - mu) / jnp.sqrt(var + LN_EPS) * p["gamma"] + p["beta"])

    def cell(xt, h, c, wih, whh, b):
        gates = [xt @ wih[k] + h @ whh[k] + b[k] for k in range(4)]
        i = jax.nn.sigmoid(gates[0]); f = jax.nn.sigmoid(gates[1])
        g = jnp.tanh(gates[2]); o = jax.nn.sigmoid(gates[3])
        c = f * c + i * g
        return o * jnp.tanh(c), c

    h = jnp.zeros((B, H), jnp.float32)
    c = jnp.zeros((B, H), jnp.float32)
    for t in range(T):
        h, c = cell(e[t], h, c, p["wih_f"], p["whh_f"], p["b_f"])
    hr, _ = cell(e[T - 1], jnp.zeros((B, H)), jnp.zeros((B, H)),
                 p["wih_r"], p["whh_r"], p["b_r"])
    s = 0.5 * (h + hr)
    return jnp.tanh(s @ p["w_fc"] + p["b_fc"])


# ---------------------------------- main ----------------------------------- #
if __name__ == "__main__":
    B, T = 2, 8
    key = jax.random.PRNGKey(0)
    kx, kp = jax.random.split(key)
    # batch-first like the PyTorch module, then transpose to the kernel layout
    state_bf = jax.random.normal(kx, (B, T, STATE_DIM), jnp.float32)   # (B, T, 24)
    x_tm = jnp.transpose(state_bf, (1, 0, 2))                          # (T, B, 24)

    params = init_params(kp)
    packed = pack_params(params)

    out = jax.block_until_ready(actor_forward(x_tm, packed))
    ref = jax.block_until_ready(actor_ref(x_tm, params))

    assert out.shape == (B, ACTION_DIM)
    assert np.allclose(np.asarray(out), np.asarray(ref), atol=1e-5, rtol=1e-5), (
        f"mismatch: {np.abs(np.asarray(out) - np.asarray(ref)).max()}")
    print("KERNEL_OK")
</pallas_src>

<mosaic_0001>
module attributes {stable_mosaic.version = 11 : i64} {
  func.func @actor_kernel(%arg0: memref<64x24xf32, #tpu.memory_space<vmem>>, %arg1: memref<24x72xf32, #tpu.memory_space<vmem>>, %arg2: memref<1x72xf32, #tpu.memory_space<vmem>>, %arg3: memref<1x72xf32, #tpu.memory_space<vmem>>, %arg4: memref<1x72xf32, #tpu.memory_space<vmem>>, %arg5: memref<72x1024xf32, #tpu.memory_space<vmem>>, %arg6: memref<1x1024xf32, #tpu.memory_space<vmem>>, %arg7: memref<128x512xf32, #tpu.memory_space<vmem>>, %arg8: memref<128x4xf32, #tpu.memory_space<vmem>>, %arg9: memref<1x4xf32, #tpu.memory_space<vmem>>, %arg10: memref<8x4xf32, #tpu.memory_space<vmem>>) attributes {dimension_semantics = [], scalar_prefetch = 0 : i64, scratch_operands = 0 : i64, tpu.core_type = #tpu.core_type<tc>} {
    %c0 = arith.constant 0 : index
    %c0_0 = arith.constant 0 : index
    %0 = vector.load %arg0[%c0, %c0_0] : memref<64x24xf32, #tpu.memory_space<vmem>>, vector<64x24xf32>
    %c0_1 = arith.constant 0 : index
    %c0_2 = arith.constant 0 : index
    %1 = vector.load %arg1[%c0_1, %c0_2] : memref<24x72xf32, #tpu.memory_space<vmem>>, vector<24x72xf32>
    %cst = arith.constant dense<0.000000e+00> : vector<64x72xf32>
    %2 = tpu.matmul %0, %1, %cst {dimension_numbers = #tpu.dot_dimension_numbers<[1], [0], [0], [1], [0, 0, 1, 1], [], []>} : vector<64x24xf32>, vector<24x72xf32>, vector<64x72xf32> -> vector<64x72xf32>
    %c0_3 = arith.constant 0 : index
    %c0_4 = arith.constant 0 : index
    %3 = vector.load %arg2[%c0_3, %c0_4] : memref<1x72xf32, #tpu.memory_space<vmem>>, vector<1x72xf32>
    %4 = vector.broadcast %3 : vector<1x72xf32> to vector<64x72xf32>
    %5 = arith.addf %2, %4 : vector<64x72xf32>
    %cst_5 = arith.constant dense<0.000000e+00> : vector<64xf32>
    %6 = vector.multi_reduction <add>, %5, %cst_5 [1] : vector<64x72xf32> to vector<64xf32>
    %7 = vector.shape_cast %6 : vector<64xf32> to vector<64x1xf32>
    %cst_6 = arith.constant 7.200000e+01 : f32
    %8 = vector.broadcast %cst_6 : f32 to vector<64x1xf32>
    %9 = arith.divf %7, %8 : vector<64x1xf32>
    %10 = arith.mulf %5, %5 : vector<64x72xf32>
    %cst_7 = arith.constant dense<0.000000e+00> : vector<64xf32>
    %11 = vector.multi_reduction <add>, %10, %cst_7 [1] : vector<64x72xf32> to vector<64xf32>
    %12 = vector.shape_cast %11 : vector<64xf32> to vector<64x1xf32>
    %cst_8 = arith.constant 7.200000e+01 : f32
    %13 = vector.broadcast %cst_8 : f32 to vector<64x1xf32>
    %14 = arith.divf %12, %13 : vector<64x1xf32>
    %15 = vector.broadcast %9 : vector<64x1xf32> to vector<64x72xf32>
    %16 = arith.subf %5, %15 : vector<64x72xf32>
    %17 = arith.mulf %9, %9 : vector<64x1xf32>
    %18 = arith.subf %14, %17 : vector<64x1xf32>
    %cst_9 = arith.constant 9.99999974E-6 : f32
    %19 = vector.broadcast %cst_9 : f32 to vector<64x1xf32>
    %20 = arith.addf %18, %19 : vector<64x1xf32>
    %21 = math.rsqrt %20 : vector<64x1xf32>
    %22 = vector.broadcast %21 : vector<64x1xf32> to vector<64x72xf32>
    %23 = arith.mulf %16, %22 : vector<64x72xf32>
    %c0_10 = arith.constant 0 : index
    %c0_11 = arith.constant 0 : index
    %24 = vector.load %arg3[%c0_10, %c0_11] : memref<1x72xf32, #tpu.memory_space<vmem>>, vector<1x72xf32>
    %25 = vector.broadcast %24 : vector<1x72xf32> to vector<64x72xf32>
    %26 = arith.mulf %23, %25 : vector<64x72xf32>
    %c0_12 = arith.constant 0 : index
    %c0_13 = arith.constant 0 : index
    %27 = vector.load %arg4[%c0_12, %c0_13] : memref<1x72xf32, #tpu.memory_space<vmem>>, vector<1x72xf32>
    %28 = vector.broadcast %27 : vector<1x72xf32> to vector<64x72xf32>
    %29 = arith.addf %26, %28 : vector<64x72xf32>
    %30 = math.tanh %29 : vector<64x72xf32>
    %c0_14 = arith.constant 0 : index
    %c0_15 = arith.constant 0 : index
    %31 = vector.load %arg5[%c0_14, %c0_15] : memref<72x1024xf32, #tpu.memory_space<vmem>>, vector<72x1024xf32>
    %cst_16 = arith.constant dense<0.000000e+00> : vector<64x1024xf32>
    %32 = tpu.matmul %30, %31, %cst_16 {dimension_numbers = #tpu.dot_dimension_numbers<[1], [0], [0], [1], [0, 0, 1, 1], [], []>} : vector<64x72xf32>, vector<72x1024xf32>, vector<64x1024xf32> -> vector<64x1024xf32>
    %c0_17 = arith.constant 0 : index
    %c0_18 = arith.constant 0 : index
    %33 = vector.load %arg6[%c0_17, %c0_18] : memref<1x1024xf32, #tpu.memory_space<vmem>>, vector<1x1024xf32>
    %34 = vector.broadcast %33 : vector<1x1024xf32> to vector<64x1024xf32>
    %35 = arith.addf %32, %34 : vector<64x1024xf32>
    %36 = vector.extract_strided_slice %35 {offsets = [0, 0], sizes = [64, 512], strides = [1, 1]} : vector<64x1024xf32> to vector<64x512xf32>
    %37 = vector.extract_strided_slice %35 {offsets = [56, 512], sizes = [8, 512], strides = [1, 1]} : vector<64x1024xf32> to vector<8x512xf32>
    %38 = math.tanh %37 : vector<8x512xf32>
    %39 = vector.extract_strided_slice %38 {offsets = [0, 0], sizes = [8, 128], strides = [1, 1]} : vector<8x512xf32> to vector<8x128xf32>
    %cst_19 = arith.constant 5.000000e-01 : f32
    %40 = vector.broadcast %cst_19 : f32 to vector<8x128xf32>
    %41 = arith.mulf %40, %39 : vector<8x128xf32>
    %cst_20 = arith.constant 5.000000e-01 : f32
    %42 = vector.broadcast %cst_20 : f32 to vector<8x128xf32>
    %43 = arith.addf %41, %42 : vector<8x128xf32>
    %44 = vector.extract_strided_slice %38 {offsets = [0, 256], sizes = [8, 128], strides = [1, 1]} : vector<8x512xf32> to vector<8x128xf32>
    %45 = vector.extract_strided_slice %38 {offsets = [0, 384], sizes = [8, 128], strides = [1, 1]} : vector<8x512xf32> to vector<8x128xf32>
    %cst_21 = arith.constant 5.000000e-01 : f32
    %46 = vector.broadcast %cst_21 : f32 to vector<8x128xf32>
    %47 = arith.mulf %46, %45 : vector<8x128xf32>
    %cst_22 = arith.constant 5.000000e-01 : f32
    %48 = vector.broadcast %cst_22 : f32 to vector<8x128xf32>
    %49 = arith.addf %47, %48 : vector<8x128xf32>
    %50 = arith.mulf %43, %44 : vector<8x128xf32>
    %51 = math.tanh %50 : vector<8x128xf32>
    %52 = arith.mulf %49, %51 : vector<8x128xf32>
    %c0_23 = arith.constant 0 : index
    %c0_24 = arith.constant 0 : index
    %53 = vector.load %arg7[%c0_23, %c0_24] : memref<128x512xf32, #tpu.memory_space<vmem>>, vector<128x512xf32>
    %54 = vector.extract_strided_slice %36 {offsets = [0, 0], sizes = [8, 512], strides = [1, 1]} : vector<64x512xf32> to vector<8x512xf32>
    %55 = math.tanh %54 : vector<8x512xf32>
    %56 = vector.extract_strided_slice %55 {offsets = [0, 0], sizes = [8, 128], strides = [1, 1]} : vector<8x512xf32> to vector<8x128xf32>
    %cst_25 = arith.constant 5.000000e-01 : f32
    %57 = vector.broadcast %cst_25 : f32 to vector<8x128xf32>
    %58 = arith.mulf %57, %56 : vector<8x128xf32>
    %cst_26 = arith.constant 5.000000e-01 : f32
    %59 = vector.broadcast %cst_26 : f32 to vector<8x128xf32>
    %60 = arith.addf %58, %59 : vector<8x128xf32>
    %61 = vector.extract_strided_slice %55 {offsets = [0, 256], sizes = [8, 128], strides = [1, 1]} : vector<8x512xf32> to vector<8x128xf32>
    %62 = vector.extract_strided_slice %55 {offsets = [0, 384], sizes = [8, 128], strides = [1, 1]} : vector<8x512xf32> to vector<8x128xf32>
    %cst_27 = arith.constant 5.000000e-01 : f32
    %63 = vector.broadcast %cst_27 : f32 to vector<8x128xf32>
    %64 = arith.mulf %63, %62 : vector<8x128xf32>
    %cst_28 = arith.constant 5.000000e-01 : f32
    %65 = vector.broadcast %cst_28 : f32 to vector<8x128xf32>
    %66 = arith.addf %64, %65 : vector<8x128xf32>
    %67 = arith.mulf %60, %61 : vector<8x128xf32>
    %68 = math.tanh %67 : vector<8x128xf32>
    %69 = arith.mulf %66, %68 : vector<8x128xf32>
    %70 = vector.extract_strided_slice %36 {offsets = [8, 0], sizes = [8, 512], strides = [1, 1]} : vector<64x512xf32> to vector<8x512xf32>
    %cst_29 = arith.constant dense<0.000000e+00> : vector<8x512xf32>
    %71 = tpu.matmul %69, %53, %cst_29 {dimension_numbers = #tpu.dot_dimension_numbers<[1], [0], [0], [1], [0, 0, 1, 1], [], []>} : vector<8x128xf32>, vector<128x512xf32>, vector<8x512xf32> -> vector<8x512xf32>
    %72 = arith.addf %70, %71 : vector<8x512xf32>
    %73 = math.tanh %72 : vector<8x512xf32>
    %74 = vector.extract_strided_slice %73 {offsets = [0, 0], sizes = [8, 128], strides = [1, 1]} : vector<8x512xf32> to vector<8x128xf32>
    %cst_30 = arith.constant 5.000000e-01 : f32
    %75 = vector.broadcast %cst_30 : f32 to vector<8x128xf32>
    %76 = arith.mulf %75, %74 : vector<8x128xf32>
    %cst_31 = arith.constant 5.000000e-01 : f32
    %77 = vector.broadcast %cst_31 : f32 to vector<8x128xf32>
    %78 = arith.addf %76, %77 : vector<8x128xf32>
    %79 = vector.extract_strided_slice %73 {offsets = [0, 128], sizes = [8, 128], strides = [1, 1]} : vector<8x512xf32> to vector<8x128xf32>
    %cst_32 = arith.constant 5.000000e-01 : f32
    %80 = vector.broadcast %cst_32 : f32 to vector<8x128xf32>
    %81 = arith.mulf %80, %79 : vector<8x128xf32>
    %cst_33 = arith.constant 5.000000e-01 : f32
    %82 = vector.broadcast %cst_33 : f32 to vector<8x128xf32>
    %83 = arith.addf %81, %82 : vector<8x128xf32>
    %84 = vector.extract_strided_slice %73 {offsets = [0, 256], sizes = [8, 128], strides = [1, 1]} : vector<8x512xf32> to vector<8x128xf32>
    %85 = vector.extract_strided_slice %73 {offsets = [0, 384], sizes = [8, 128], strides = [1, 1]} : vector<8x512xf32> to vector<8x128xf32>
    %cst_34 = arith.constant 5.000000e-01 : f32
    %86 = vector.broadcast %cst_34 : f32 to vector<8x128xf32>
    %87 = arith.mulf %86, %85 : vector<8x128xf32>
    %cst_35 = arith.constant 5.000000e-01 : f32
    %88 = vector.broadcast %cst_35 : f32 to vector<8x128xf32>
    %89 = arith.addf %87, %88 : vector<8x128xf32>
    %90 = arith.mulf %83, %67 : vector<8x128xf32>
    %91 = arith.mulf %78, %84 : vector<8x128xf32>
    %92 = arith.addf %90, %91 : vector<8x128xf32>
    %93 = math.tanh %92 : vector<8x128xf32>
    %94 = arith.mulf %89, %93 : vector<8x128xf32>
    %95 = vector.extract_strided_slice %36 {offsets = [16, 0], sizes = [8, 512], strides = [1, 1]} : vector<64x512xf32> to vector<8x512xf32>
    %cst_36 = arith.constant dense<0.000000e+00> : vector<8x512xf32>
    %96 = tpu.matmul %94, %53, %cst_36 {dimension_numbers = #tpu.dot_dimension_numbers<[1], [0], [0], [1], [0, 0, 1, 1], [], []>} : vector<8x128xf32>, vector<128x512xf32>, vector<8x512xf32> -> vector<8x512xf32>
    %97 = arith.addf %95, %96 : vector<8x512xf32>
    %98 = math.tanh %97 : vector<8x512xf32>
    %99 = vector.extract_strided_slice %98 {offsets = [0, 0], sizes = [8, 128], strides = [1, 1]} : vector<8x512xf32> to vector<8x128xf32>
    %cst_37 = arith.constant 5.000000e-01 : f32
    %100 = vector.broadcast %cst_37 : f32 to vector<8x128xf32>
    %101 = arith.mulf %100, %99 : vector<8x128xf32>
    %cst_38 = arith.constant 5.000000e-01 : f32
    %102 = vector.broadcast %cst_38 : f32 to vector<8x128xf32>
    %103 = arith.addf %101, %102 : vector<8x128xf32>
    %104 = vector.extract_strided_slice %98 {offsets = [0, 128], sizes = [8, 128], strides = [1, 1]} : vector<8x512xf32> to vector<8x128xf32>
    %cst_39 = arith.constant 5.000000e-01 : f32
    %105 = vector.broadcast %cst_39 : f32 to vector<8x128xf32>
    %106 = arith.mulf %105, %104 : vector<8x128xf32>
    %cst_40 = arith.constant 5.000000e-01 : f32
    %107 = vector.broadcast %cst_40 : f32 to vector<8x128xf32>
    %108 = arith.addf %106, %107 : vector<8x128xf32>
    %109 = vector.extract_strided_slice %98 {offsets = [0, 256], sizes = [8, 128], strides = [1, 1]} : vector<8x512xf32> to vector<8x128xf32>
    %110 = vector.extract_strided_slice %98 {offsets = [0, 384], sizes = [8, 128], strides = [1, 1]} : vector<8x512xf32> to vector<8x128xf32>
    %cst_41 = arith.constant 5.000000e-01 : f32
    %111 = vector.broadcast %cst_41 : f32 to vector<8x128xf32>
    %112 = arith.mulf %111, %110 : vector<8x128xf32>
    %cst_42 = arith.constant 5.000000e-01 : f32
    %113 = vector.broadcast %cst_42 : f32 to vector<8x128xf32>
    %114 = arith.addf %112, %113 : vector<8x128xf32>
    %115 = arith.mulf %108, %92 : vector<8x128xf32>
    %116 = arith.mulf %103, %109 : vector<8x128xf32>
    %117 = arith.addf %115, %116 : vector<8x128xf32>
    %118 = math.tanh %117 : vector<8x128xf32>
    %119 = arith.mulf %114, %118 : vector<8x128xf32>
    %120 = vector.extract_strided_slice %36 {offsets = [24, 0], sizes = [8, 512], strides = [1, 1]} : vector<64x512xf32> to vector<8x512xf32>
    %cst_43 = arith.constant dense<0.000000e+00> : vector<8x512xf32>
    %121 = tpu.matmul %119, %53, %cst_43 {dimension_numbers = #tpu.dot_dimension_numbers<[1], [0], [0], [1], [0, 0, 1, 1], [], []>} : vector<8x128xf32>, vector<128x512xf32>, vector<8x512xf32> -> vector<8x512xf32>
    %122 = arith.addf %120, %121 : vector<8x512xf32>
    %123 = math.tanh %122 : vector<8x512xf32>
    %124 = vector.extract_strided_slice %123 {offsets = [0, 0], sizes = [8, 128], strides = [1, 1]} : vector<8x512xf32> to vector<8x128xf32>
    %cst_44 = arith.constant 5.000000e-01 : f32
    %125 = vector.broadcast %cst_44 : f32 to vector<8x128xf32>
    %126 = arith.mulf %125, %124 : vector<8x128xf32>
    %cst_45 = arith.constant 5.000000e-01 : f32
    %127 = vector.broadcast %cst_45 : f32 to vector<8x128xf32>
    %128 = arith.addf %126, %127 : vector<8x128xf32>
    %129 = vector.extract_strided_slice %123 {offsets = [0, 128], sizes = [8, 128], strides = [1, 1]} : vector<8x512xf32> to vector<8x128xf32>
    %cst_46 = arith.constant 5.000000e-01 : f32
    %130 = vector.broadcast %cst_46 : f32 to vector<8x128xf32>
    %131 = arith.mulf %130, %129 : vector<8x128xf32>
    %cst_47 = arith.constant 5.000000e-01 : f32
    %132 = vector.broadcast %cst_47 : f32 to vector<8x128xf32>
    %133 = arith.addf %131, %132 : vector<8x128xf32>
    %134 = vector.extract_strided_slice %123 {offsets = [0, 256], sizes = [8, 128], strides = [1, 1]} : vector<8x512xf32> to vector<8x128xf32>
    %135 = vector.extract_strided_slice %123 {offsets = [0, 384], sizes = [8, 128], strides = [1, 1]} : vector<8x512xf32> to vector<8x128xf32>
    %cst_48 = arith.constant 5.000000e-01 : f32
    %136 = vector.broadcast %cst_48 : f32 to vector<8x128xf32>
    %137 = arith.mulf %136, %135 : vector<8x128xf32>
    %cst_49 = arith.constant 5.000000e-01 : f32
    %138 = vector.broadcast %cst_49 : f32 to vector<8x128xf32>
    %139 = arith.addf %137, %138 : vector<8x128xf32>
    %140 = arith.mulf %133, %117 : vector<8x128xf32>
    %141 = arith.mulf %128, %134 : vector<8x128xf32>
    %142 = arith.addf %140, %141 : vector<8x128xf32>
    %143 = math.tanh %142 : vector<8x128xf32>
    %144 = arith.mulf %139, %143 : vector<8x128xf32>
    %145 = vector.extract_strided_slice %36 {offsets = [32, 0], sizes = [8, 512], strides = [1, 1]} : vector<64x512xf32> to vector<8x512xf32>
    %cst_50 = arith.constant dense<0.000000e+00> : vector<8x512xf32>
    %146 = tpu.matmul %144, %53, %cst_50 {dimension_numbers = #tpu.dot_dimension_numbers<[1], [0], [0], [1], [0, 0, 1, 1], [], []>} : vector<8x128xf32>, vector<128x512xf32>, vector<8x512xf32> -> vector<8x512xf32>
    %147 = arith.addf %145, %146 : vector<8x512xf32>
    %148 = math.tanh %147 : vector<8x512xf32>
    %149 = vector.extract_strided_slice %148 {offsets = [0, 0], sizes = [8, 128], strides = [1, 1]} : vector<8x512xf32> to vector<8x128xf32>
    %cst_51 = arith.constant 5.000000e-01 : f32
    %150 = vector.broadcast %cst_51 : f32 to vector<8x128xf32>
    %151 = arith.mulf %150, %149 : vector<8x128xf32>
    %cst_52 = arith.constant 5.000000e-01 : f32
    %152 = vector.broadcast %cst_52 : f32 to vector<8x128xf32>
    %153 = arith.addf %151, %152 : vector<8x128xf32>
    %154 = vector.extract_strided_slice %148 {offsets = [0, 128], sizes = [8, 128], strides = [1, 1]} : vector<8x512xf32> to vector<8x128xf32>
    %cst_53 = arith.constant 5.000000e-01 : f32
    %155 = vector.broadcast %cst_53 : f32 to vector<8x128xf32>
    %156 = arith.mulf %155, %154 : vector<8x128xf32>
    %cst_54 = arith.constant 5.000000e-01 : f32
    %157 = vector.broadcast %cst_54 : f32 to vector<8x128xf32>
    %158 = arith.addf %156, %157 : vector<8x128xf32>
    %159 = vector.extract_strided_slice %148 {offsets = [0, 256], sizes = [8, 128], strides = [1, 1]} : vector<8x512xf32> to vector<8x128xf32>
    %160 = vector.extract_strided_slice %148 {offsets = [0, 384], sizes = [8, 128], strides = [1, 1]} : vector<8x512xf32> to vector<8x128xf32>
    %cst_55 = arith.constant 5.000000e-01 : f32
    %161 = vector.broadcast %cst_55 : f32 to vector<8x128xf32>
    %162 = arith.mulf %161, %160 : vector<8x128xf32>
    %cst_56 = arith.constant 5.000000e-01 : f32
    %163 = vector.broadcast %cst_56 : f32 to vector<8x128xf32>
    %164 = arith.addf %162, %163 : vector<8x128xf32>
    %165 = arith.mulf %158, %142 : vector<8x128xf32>
    %166 = arith.mulf %153, %159 : vector<8x128xf32>
    %167 = arith.addf %165, %166 : vector<8x128xf32>
    %168 = math.tanh %167 : vector<8x128xf32>
    %169 = arith.mulf %164, %168 : vector<8x128xf32>
    %170 = vector.extract_strided_slice %36 {offsets = [40, 0], sizes = [8, 512], strides = [1, 1]} : vector<64x512xf32> to vector<8x512xf32>
    %cst_57 = arith.constant dense<0.000000e+00> : vector<8x512xf32>
    %171 = tpu.matmul %169, %53, %cst_57 {dimension_numbers = #tpu.dot_dimension_numbers<[1], [0], [0], [1], [0, 0, 1, 1], [], []>} : vector<8x128xf32>, vector<128x512xf32>, vector<8x512xf32> -> vector<8x512xf32>
    %172 = arith.addf %170, %171 : vector<8x512xf32>
    %173 = math.tanh %172 : vector<8x512xf32>
    %174 = vector.extract_strided_slice %173 {offsets = [0, 0], sizes = [8, 128], strides = [1, 1]} : vector<8x512xf32> to vector<8x128xf32>
    %cst_58 = arith.constant 5.000000e-01 : f32
    %175 = vector.broadcast %cst_58 : f32 to vector<8x128xf32>
    %176 = arith.mulf %175, %174 : vector<8x128xf32>
    %cst_59 = arith.constant 5.000000e-01 : f32
    %177 = vector.broadcast %cst_59 : f32 to vector<8x128xf32>
    %178 = arith.addf %176, %177 : vector<8x128xf32>
    %179 = vector.extract_strided_slice %173 {offsets = [0, 128], sizes = [8, 128], strides = [1, 1]} : vector<8x512xf32> to vector<8x128xf32>
    %cst_60 = arith.constant 5.000000e-01 : f32
    %180 = vector.broadcast %cst_60 : f32 to vector<8x128xf32>
    %181 = arith.mulf %180, %179 : vector<8x128xf32>
    %cst_61 = arith.constant 5.000000e-01 : f32
    %182 = vector.broadcast %cst_61 : f32 to vector<8x128xf32>
    %183 = arith.addf %181, %182 : vector<8x128xf32>
    %184 = vector.extract_strided_slice %173 {offsets = [0, 256], sizes = [8, 128], strides = [1, 1]} : vector<8x512xf32> to vector<8x128xf32>
    %185 = vector.extract_strided_slice %173 {offsets = [0, 384], sizes = [8, 128], strides = [1, 1]} : vector<8x512xf32> to vector<8x128xf32>
    %cst_62 = arith.constant 5.000000e-01 : f32
    %186 = vector.broadcast %cst_62 : f32 to vector<8x128xf32>
    %187 = arith.mulf %186, %185 : vector<8x128xf32>
    %cst_63 = arith.constant 5.000000e-01 : f32
    %188 = vector.broadcast %cst_63 : f32 to vector<8x128xf32>
    %189 = arith.addf %187, %188 : vector<8x128xf32>
    %190 = arith.mulf %183, %167 : vector<8x128xf32>
    %191 = arith.mulf %178, %184 : vector<8x128xf32>
    %192 = arith.addf %190, %191 : vector<8x128xf32>
    %193 = math.tanh %192 : vector<8x128xf32>
    %194 = arith.mulf %189, %193 : vector<8x128xf32>
    %195 = vector.extract_strided_slice %36 {offsets = [48, 0], sizes = [8, 512], strides = [1, 1]} : vector<64x512xf32> to vector<8x512xf32>
    %cst_64 = arith.constant dense<0.000000e+00> : vector<8x512xf32>
    %196 = tpu.matmul %194, %53, %cst_64 {dimension_numbers = #tpu.dot_dimension_numbers<[1], [0], [0], [1], [0, 0, 1, 1], [], []>} : vector<8x128xf32>, vector<128x512xf32>, vector<8x512xf32> -> vector<8x512xf32>
    %197 = arith.addf %195, %196 : vector<8x512xf32>
    %198 = math.tanh %197 : vector<8x512xf32>
    %199 = vector.extract_strided_slice %198 {offsets = [0, 0], sizes = [8, 128], strides = [1, 1]} : vector<8x512xf32> to vector<8x128xf32>
    %cst_65 = arith.constant 5.000000e-01 : f32
    %200 = vector.broadcast %cst_65 : f32 to vector<8x128xf32>
    %201 = arith.mulf %200, %199 : vector<8x128xf32>
    %cst_66 = arith.constant 5.000000e-01 : f32
    %202 = vector.broadcast %cst_66 : f32 to vector<8x128xf32>
    %203 = arith.addf %201, %202 : vector<8x128xf32>
    %204 = vector.extract_strided_slice %198 {offsets = [0, 128], sizes = [8, 128], strides = [1, 1]} : vector<8x512xf32> to vector<8x128xf32>
    %cst_67 = arith.constant 5.000000e-01 : f32
    %205 = vector.broadcast %cst_67 : f32 to vector<8x128xf32>
    %206 = arith.mulf %205, %204 : vector<8x128xf32>
    %cst_68 = arith.constant 5.000000e-01 : f32
    %207 = vector.broadcast %cst_68 : f32 to vector<8x128xf32>
    %208 = arith.addf %206, %207 : vector<8x128xf32>
    %209 = vector.extract_strided_slice %198 {offsets = [0, 256], sizes = [8, 128], strides = [1, 1]} : vector<8x512xf32> to vector<8x128xf32>
    %210 = vector.extract_strided_slice %198 {offsets = [0, 384], sizes = [8, 128], strides = [1, 1]} : vector<8x512xf32> to vector<8x128xf32>
    %cst_69 = arith.constant 5.000000e-01 : f32
    %211 = vector.broadcast %cst_69 : f32 to vector<8x128xf32>
    %212 = arith.mulf %211, %210 : vector<8x128xf32>
    %cst_70 = arith.constant 5.000000e-01 : f32
    %213 = vector.broadcast %cst_70 : f32 to vector<8x128xf32>
    %214 = arith.addf %212, %213 : vector<8x128xf32>
    %215 = arith.mulf %208, %192 : vector<8x128xf32>
    %216 = arith.mulf %203, %209 : vector<8x128xf32>
    %217 = arith.addf %215, %216 : vector<8x128xf32>
    %218 = math.tanh %217 : vector<8x128xf32>
    %219 = arith.mulf %214, %218 : vector<8x128xf32>
    %220 = vector.extract_strided_slice %36 {offsets = [56, 0], sizes = [8, 512], strides = [1, 1]} : vector<64x512xf32> to vector<8x512xf32>
    %cst_71 = arith.constant dense<0.000000e+00> : vector<8x512xf32>
    %221 = tpu.matmul %219, %53, %cst_71 {dimension_numbers = #tpu.dot_dimension_numbers<[1], [0], [0], [1], [0, 0, 1, 1], [], []>} : vector<8x128xf32>, vector<128x512xf32>, vector<8x512xf32> -> vector<8x512xf32>
    %222 = arith.addf %220, %221 : vector<8x512xf32>
    %223 = math.tanh %222 : vector<8x512xf32>
    %224 = vector.extract_strided_slice %223 {offsets = [0, 0], sizes = [8, 128], strides = [1, 1]} : vector<8x512xf32> to vector<8x128xf32>
    %cst_72 = arith.constant 5.000000e-01 : f32
    %225 = vector.broadcast %cst_72 : f32 to vector<8x128xf32>
    %226 = arith.mulf %225, %224 : vector<8x128xf32>
    %cst_73 = arith.constant 5.000000e-01 : f32
    %227 = vector.broadcast %cst_73 : f32 to vector<8x128xf32>
    %228 = arith.addf %226, %227 : vector<8x128xf32>
    %229 = vector.extract_strided_slice %223 {offsets = [0, 128], sizes = [8, 128], strides = [1, 1]} : vector<8x512xf32> to vector<8x128xf32>
    %cst_74 = arith.constant 5.000000e-01 : f32
    %230 = vector.broadcast %cst_74 : f32 to vector<8x128xf32>
    %231 = arith.mulf %230, %229 : vector<8x128xf32>
    %cst_75 = arith.constant 5.000000e-01 : f32
    %232 = vector.broadcast %cst_75 : f32 to vector<8x128xf32>
    %233 = arith.addf %231, %232 : vector<8x128xf32>
    %234 = vector.extract_strided_slice %223 {offsets = [0, 256], sizes = [8, 128], strides = [1, 1]} : vector<8x512xf32> to vector<8x128xf32>
    %235 = vector.extract_strided_slice %223 {offsets = [0, 384], sizes = [8, 128], strides = [1, 1]} : vector<8x512xf32> to vector<8x128xf32>
    %cst_76 = arith.constant 5.000000e-01 : f32
    %236 = vector.broadcast %cst_76 : f32 to vector<8x128xf32>
    %237 = arith.mulf %236, %235 : vector<8x128xf32>
    %cst_77 = arith.constant 5.000000e-01 : f32
    %238 = vector.broadcast %cst_77 : f32 to vector<8x128xf32>
    %239 = arith.addf %237, %238 : vector<8x128xf32>
    %240 = arith.mulf %233, %217 : vector<8x128xf32>
    %241 = arith.mulf %228, %234 : vector<8x128xf32>
    %242 = arith.addf %240, %241 : vector<8x128xf32>
    %243 = math.tanh %242 : vector<8x128xf32>
    %244 = arith.mulf %239, %243 : vector<8x128xf32>
    %245 = arith.addf %244, %52 : vector<8x128xf32>
    %cst_78 = arith.constant 5.000000e-01 : f32
    %246 = vector.broadcast %cst_78 : f32 to vector<8x128xf32>
    %247 = arith.mulf %246, %245 : vector<8x128xf32>
    %c0_79 = arith.constant 0 : index
    %c0_80 = arith.constant 0 : index
    %248 = vector.load %arg8[%c0_79, %c0_80] : memref<128x4xf32, #tpu.memory_space<vmem>>, vector<128x4xf32>
    %cst_81 = arith.constant dense<0.000000e+00> : vector<8x4xf32>
    %249 = tpu.matmul %247, %248, %cst_81 {dimension_numbers = #tpu.dot_dimension_numbers<[1], [0], [0], [1], [0, 0, 1, 1], [], []>} : vector<8x128xf32>, vector<128x4xf32>, vector<8x4xf32> -> vector<8x4xf32>
    %c0_82 = arith.constant 0 : index
    %c0_83 = arith.constant 0 : index
    %250 = vector.load %arg9[%c0_82, %c0_83] : memref<1x4xf32, #tpu.memory_space<vmem>>, vector<1x4xf32>
    %251 = vector.broadcast %250 : vector<1x4xf32> to vector<8x4xf32>
    %252 = arith.addf %249, %251 : vector<8x4xf32>
    %253 = math.tanh %252 : vector<8x4xf32>
    %c0_84 = arith.constant 0 : index
    %c0_85 = arith.constant 0 : index
    %254 = vector.load %arg10[%c0_84, %c0_85] : memref<8x4xf32, #tpu.memory_space<vmem>>, vector<8x4xf32>
    tpu.vector_store %arg10[%c0_84, %c0_85], %253 {strides = array<i32>} : memref<8x4xf32, #tpu.memory_space<vmem>>, vector<8x4xf32>,
    return
  }
}

</mosaic_0001>

<bundles_post_ra>
// kernel: tpu_custom_call.1
= control target key start
LH: loop header
LB: loop body
LE: loop exit
PB: predicated region body
PF: predicated region fallthrough
CT: control target
= control target key end

     0   :  { %15 = vsyncpa [#allocation3], 0  ;;  %s3959_s0 = inlined_call_operand.vmem [shape: f32[64,24], index: 0, kind: input, shape index: {}]   ;;  %s3960_s1 = inlined_call_operand.vmem [shape: f32[24,72], index: 1, kind: input, shape index: {}]   ;;  %s3961_s2 = inlined_call_operand.vmem [shape: f32[1,72], index: 2, kind: input, shape index: {}]   ;;  %s3962_s3 = inlined_call_operand.vmem [shape: f32[1,72], index: 3, kind: input, shape index: {}]   ;;  %s3963_s4 = inlined_call_operand.vmem [shape: f32[1,72], index: 4, kind: input, shape index: {}]   ;;  %s3964_s5 = inlined_call_operand.hbm [shape: f32[72,1024], index: 5, kind: input, shape index: {}]   ;;  %s3965_s6 = inlined_call_operand.vmem [shape: f32[1,1024], index: 6, kind: input, shape index: {}]   ;;  %s3966_s7 = inlined_call_operand.hbm [shape: f32[128,512], index: 7, kind: input, shape index: {}]   ;;  %s3967_s8 = inlined_call_operand.vmem [shape: f32[128,4], index: 8, kind: input, shape index: {}]   ;;  %s3968_s9 = inlined_call_operand.vmem [shape: f32[1,4], index: 9, kind: input, shape index: {}]   ;;  %s3969_s10 = inlined_call_operand.vmem [shape: f32[8,4], index: 10, kind: output, shape index: {}]  }
   0x1   :  { %16 = vsyncpa [#allocation5], 0  ;;  %s3149_s13 = smov [#allocation2]   ;;  %s3101_s17 = scalar_lea.hbm %s3964_s5, 9216 }
   0x2   :  { %s32_s14 = sshll.u32 %s3149_s13, 4  ;;  %p3102_p0 = scmp.ne.s32.totalorder %s3964_s5, %s3101_s17  ;;  %s33_s14 = int_to_ptr.vmem [resolvable:$true] %s32_s14 }
   0x3   :  { %p3105_p1 = scmp.lt.u32.totalorder %s3101_s17, %s3964_s5 }
   0x5   :  { %p3107_p2 = pnand %p3105_p1, %p3102_p0 }
   0x7   :  { %3110 = shalt.err (!%p3107_p2)
}
   0x8   :  { %s3111_s22 = scalar_lea.vmem %s33_s14, 9216  ;;  %p3116_p4 = scmp.lt.s32.totalorder %s33_s14, %s33_s14 }
   0x9   :  { %p3112_p3 = scmp.ne.s32.totalorder %s33_s14, %s3111_s22  ;;  %p3117_p5 = scmp.lt.s32.totalorder %s3111_s22, %s3111_s22 }
   0xb   :  { %p3118_p6 = por %p3117_p5, %p3116_p4 }
   0xd   :  { %p3119_p7 = pnand %p3118_p6, %p3112_p3 }
   0xf   :  { %3122 = shalt.err (!%p3119_p7)
}
  0x10   :  { %s3150_s23 = smov 1024   ;;  %s3151_s24 = smov 64  }
  0x11   :  { %38 = dma.hbm_to_vmem [thread:$0]  %s3964_s5, 9216, %s33_s14, [#allocation3], %s3150_s23, %s3150_s23, %s3151_s24  }
  0x12   :  { %s3152_s27 = smov [#allocation4]   ;;  %s3123_s11 = scalar_lea.hbm %s3966_s7, 8192 }
  0x13   :  { %s46_s28 = sshll.u32 %s3152_s27, 4  ;;  %p3124_p8 = scmp.ne.s32.totalorder %s3966_s7, %s3123_s11  ;;  %s47_s28 = int_to_ptr.vmem [resolvable:$true] %s46_s28 }
  0x14   :  { %p3127_p9 = scmp.lt.u32.totalorder %s3123_s11, %s3966_s7 }
  0x16   :  { %p3129_p10 = pnand %p3127_p9, %p3124_p8 }
  0x18   :  { %3132 = shalt.err (!%p3129_p10)
}
  0x19   :  { %s3133_s17 = scalar_lea.vmem %s47_s28, 8192  ;;  %p3138_p12 = scmp.lt.s32.totalorder %s47_s28, %s47_s28 }
  0x1a   :  { %p3134_p11 = scmp.ne.s32.totalorder %s47_s28, %s3133_s17  ;;  %p3139_p13 = scmp.lt.s32.totalorder %s3133_s17, %s3133_s17 }
  0x1c   :  { %p3140_p0 = por %p3139_p13, %p3138_p12 }
  0x1e   :  { %p3141_p1 = pnand %p3140_p0, %p3134_p11 }
  0x20   :  { %3144 = shalt.err (!%p3141_p1)
}
  0x21   :  { %s3153_s5 = smov 512   ;;  %s3154_s14 = smov 32  }
  0x22   :  { %52 = dma.hbm_to_vmem [thread:$0]  %s3966_s7, 8192, %s47_s28, [#allocation5], %s3153_s5, %s3153_s5, %s3154_s14  }
  0x23   :  { %3145 = dma.done.wait [#allocation3], 9216  }
  0x24   :  { %3146 = vsyncadd [#allocation3], 4294958080 }
  0x25   :  { %3147 = dma.done.wait [#allocation5], 8192  }
  0x26   :  { %3148 = vsyncadd [#allocation5], 4294959104  ;;  %vm81_vm0 = vcmask 195584   ;;  %v71_v0 = vld [vmem:[%s3960_s1] sm:$0xff]  ;;  %v72_v1 = vld [vmem:[%s3960_s1 + $0x8] sm:$0xff]  ;;  %vm211_vm1 = vcmask 588800  }
  0x27   :  { %v2366_v2 = vpack.c.bf16 %v72_v1, %v71_v0  ;;  %v63_v3 = vld [vmem:[%s3959_s0] sm:$0xff]  ;;  %v73_v4 = vld [vmem:[%s3960_s1 + $0x10] sm:$0xff]  ;;  %v64_v5 = vld [vmem:[%s3959_s0 + $0x8] sm:$0xff]  ;;  %vm3157_vm2 = vmmov 0   ;;  %vm2233_vm3 = vcmask 31744  }
  0x28   :  { %2319 = vmatprep.mubr.msk.f32.mxu0 %vm81_vm0, %v63_v3  ;;  %v65_v6 = vld [vmem:[%s3959_s0 + $0x10] sm:$0xff]  ;;  %v66_v7 = vld [vmem:[%s3959_s0 + $0x18] sm:$0xff]  ;;  %v67_v8 = vld [vmem:[%s3959_s0 + $0x20] sm:$0xff] }
  0x29   :  { %2367 = vmatprep.subr.bf16.mxu0 %v2366_v2  ;;  %v68_v9 = vld [vmem:[%s3959_s0 + $0x28] sm:$0xff]  ;;  %v69_v10 = vld [vmem:[%s3959_s0 + $0x30] sm:$0xff]  ;;  %v70_v11 = vld [vmem:[%s3959_s0 + $0x38] sm:$0xff] }
  0x2a   :  { %2369 = vmatpush3.bf16.msra.mxu0 %v2366_v2  ;;  %v2241_v12 = vld [vmem:[%s3961_s2] ss:$0 sm:$0xff]  ;;  %v372_v53 = vld [vmem:[#allocation2 + $0x8] sm:$0xff] }
  0x2b   :  { %2317 = vmatprep.subr.mxu0 %v73_v4  ;;  %v380_v54 = vld [vmem:[#allocation2 + $0x48] sm:$0xff]  ;;  %v371_v56 = vld [vmem:[#allocation2] sm:$0xff] }
  0x2c   :  { %v2370_v55 = vpack.c.bf16 %v380_v54, %v372_v53  ;;  %v379_v57 = vld [vmem:[#allocation2 + $0x40] sm:$0xff]  ;;  %v388_v59 = vld [vmem:[#allocation2 + $0x88] sm:$0xff] }
  0x2d   :  { %v2372_v58 = vpack.c.bf16 %v379_v57, %v371_v56  ;;  %v396_v60 = vld [vmem:[#allocation2 + $0xc8] sm:$0xff]  ;;  %v387_v62 = vld [vmem:[#allocation2 + $0x80] sm:$0xff] }
  0x2e   :  { %2318 = vmatpush3.msra.mxu0 %v73_v4  ;;  %2906 = vmatprep.subr.bf16.mxu1 %v2370_v55  ;;  %v2374_v61 = vpack.c.bf16 %v396_v60, %v388_v59  ;;  %v395_v63 = vld [vmem:[#allocation2 + $0xc0] sm:$0xff]  ;;  %v404_v1 = vld [vmem:[#allocation2 + $0x108] sm:$0xff] }
  0x2f   :  { %2320 = vmatmul.mubr.msk.f32.vlgmr.msra.gmra.mrb[0].mxu0 %vm81_vm0, %v64_v5  ;;  %2371 = vmatprep.subr.bf16.mxu0 %v2370_v55  ;;  %v2376_v0 = vpack.c.bf16 %v395_v63, %v387_v62  ;;  %v412_v2 = vld [vmem:[#allocation2 + $0x148] sm:$0xff]  ;;  %v403_v4 = vld [vmem:[#allocation2 + $0x100] sm:$0xff] }
  0x30   :  { %2322 = vmatprep.mubr.msk.f32.mxu0 %vm81_vm0, %v65_v6  ;;  %2373 = vmatpush1.bf16.msra.mxu0 %v2372_v58  ;;  %v2378_v3 = vpack.c.bf16 %v412_v2, %v404_v1  ;;  %v411_v5 = vld [vmem:[#allocation2 + $0x140] sm:$0xff] }
  0x31   :  { %2911 = vmatpush1.bf16.msra.mxu1 %v2372_v58  ;;  %2375 = vmatprep.subr.bf16.mxu0 %v2374_v61  ;;  %v2380_v6 = vpack.c.bf16 %v411_v5, %v403_v4 }
  0x32   :  { %2907 = vmatprep.subr.bf16.mxu1 %v2374_v61 }
  0x33   :  { %2323 = vmatmul.mubr.msk.f32.gmra.mrb[2].mxu0 %vm81_vm0, %v66_v7  ;;  %v420_v7 = vld [vmem:[#allocation2 + $0x188] sm:$0xff] }
  0x34   :  { %2325 = vmatprep.mubr.msk.f32.mxu0 %vm81_vm0, %v67_v8  ;;  %2377 = vmatpush1.bf16.msra.mxu0 %v2376_v0  ;;  %v428_v8 = vld [vmem:[#allocation2 + $0x1c8] sm:$0xff] }
  0x35   :  { %2912 = vmatpush1.bf16.msra.mxu1 %v2376_v0  ;;  %2379 = vmatprep.subr.bf16.mxu0 %v2378_v3 }
  0x36   :  { %2908 = vmatprep.subr.bf16.mxu1 %v2378_v3 }
  0x37   :  { %2326 = vmatmul.mubr.msk.f32.gmra.mrb[4].mxu0 %vm81_vm0, %v68_v9  ;;  %v2382_v9 = vpack.c.bf16 %v428_v8, %v420_v7 }
  0x38   :  { %2328 = vmatprep.mubr.msk.f32.mxu0 %vm81_vm0, %v69_v10  ;;  %2381 = vmatpush1.bf16.msra.mxu0 %v2380_v6  ;;  %v419_v10 = vld [vmem:[#allocation2 + $0x180] sm:$0xff] }
  0x39   :  { %2913 = vmatpush1.bf16.msra.mxu1 %v2380_v6  ;;  %2383 = vmatprep.subr.bf16.mxu0 %v2382_v9  ;;  %v3348_v6 = vld [vmem:[%s3962_s3] ss:$0 sm:$0xff] }
  0x3a   :  { %2909 = vmatprep.subr.bf16.mxu1 %v2382_v9 }
  0x3b   :  { %2329 = vmatmul.mubr.msk.f32.gmra.mrb[6].mxu0 %vm81_vm0, %v70_v11  ;;  %v427_v11 = vld [vmem:[#allocation2 + $0x1c0] sm:$0xff] }
 0x102   :  { %v2321_v13 = vpop.f32.mrb[0].mxu0 }
 0x103   :  { %v3281_v14 = vadd.f32 %v2321_v13, %v2241_v12  ;;  %v172_v15 = vpop.f32.mrb[1].mxu0  ;;  %v436_v13 = vld [vmem:[#allocation2 + $0x208] sm:$0xff] }
 0x104   :  { %v3283_v16 = vadd.f32 %v2241_v12, %v172_v15  ;;  %v374_v15 = vld [vmem:[#allocation2 + $0x18] sm:$0xff] }
 0x105   :  { %v215_v17 = vsel %vm211_vm1, %v3281_v14, 0.0  ;;  %v246_v18 = vmul.f32 %v3281_v14, %v3281_v14 }
 0x106   :  { %216 = vadd.xlane.f32.xlu1 %v215_v17  ;;  %v212_v19 = vsel %vm211_vm1, %v3283_v16, 0.0  ;;  %v2324_v20 = vpop.f32.mrb[2].mxu0  ;;  %v245_v21 = vmul.f32 %v3283_v16, %v3283_v16  ;;  %v382_v17 = vld [vmem:[#allocation2 + $0x58] sm:$0xff] }
 0x107   :  { %213 = vadd.xlane.f32.xlu0 %v212_v19  ;;  %v3293_v22 = vadd.f32 %v2324_v20, %v2241_v12  ;;  %v182_v23 = vpop.f32.mrb[3].mxu0  ;;  %v256_v25 = vsel %vm211_vm1, %v246_v18, 0.0  ;;  %v435_v18 = vld [vmem:[#allocation2 + $0x200] sm:$0xff]  ;;  %v2386_v19 = vpack.c.bf16 %v382_v17, %v374_v15  ;;  %v3155_v20 = vmov 0.0  }
 0x108   :  { %v3295_v24 = vadd.f32 %v2241_v12, %v182_v23  ;;  %v253_v26 = vsel %vm211_vm1, %v245_v21, 0.0  ;;  %568 = vmatprep.mubr.f32.mxu0 %v3155_v20  ;;  %585 = vmatprep.mubr.f32.mxu1 %v3155_v20  ;;  %v376_v21 = vld [vmem:[#allocation2 + $0x28] sm:$0xff] }
 0x109   :  { %v248_v30 = vmul.f32 %v3293_v22, %v3293_v22  ;;  %v221_v39 = vsel %vm211_vm1, %v3293_v22, 0.0  ;;  %v384_v23 = vld [vmem:[#allocation2 + $0x68] sm:$0xff] }
 0x10a   :  { %257 = vadd.xlane.f32.xlu1 %v256_v25  ;;  %v247_v27 = vmul.f32 %v3295_v24, %v3295_v24  ;;  %v2327_v28 = vpop.f32.mrb[4].mxu0  ;;  %v218_v31 = vsel %vm211_vm1, %v3295_v24, 0.0  ;;  %v2402_v25 = vpack.c.bf16 %v384_v23, %v376_v21 }
 0x10b   :  { %254 = vadd.xlane.f32.xlu0 %v253_v26  ;;  %v192_v29 = vpop.f32.mrb[5].mxu0  ;;  %v3308_v35 = vadd.f32 %v2327_v28, %v2241_v12  ;;  %v262_v36 = vsel %vm211_vm1, %v248_v30, 0.0 }
 0x10c   :  { %v259_v32 = vsel %vm211_vm1, %v247_v27, 0.0  ;;  %v3306_v33 = vadd.f32 %v2241_v12, %v192_v29 }
 0x10d   :  { %v250_v42 = vmul.f32 %v3308_v35, %v3308_v35  ;;  %v227_v47 = vsel %vm211_vm1, %v3308_v35, 0.0 }
 0x10e   :  { %260 = vadd.xlane.f32.xlu1 %v259_v32  ;;  %v2330_v34 = vpop.f32.mrb[6].mxu0  ;;  %v249_v37 = vmul.f32 %v3306_v33, %v3306_v33  ;;  %v224_v43 = vsel %vm211_vm1, %v3306_v33, 0.0 }
 0x10f   :  { %219 = vadd.xlane.f32.xlu0 %v218_v31  ;;  %v202_v38 = vpop.f32.mrb[7].mxu0  ;;  %v3322_v44 = vadd.f32 %v2330_v34, %v2241_v12  ;;  %v268_v45 = vsel %vm211_vm1, %v250_v42, 0.0 }
 0x110   :  { %v265_v40 = vsel %vm211_vm1, %v249_v37, 0.0  ;;  %v3316_v41 = vadd.f32 %v2241_v12, %v202_v38  ;;  %v2384_v12 = vpack.c.bf16 %v427_v11, %v419_v10  ;;  %v3355_v10 = vld [vmem:[%s3963_s4] ss:$0 sm:$0xff] }
 0x111   :  { %v252_v49 = vmul.f32 %v3322_v44, %v3322_v44  ;;  %v233_v52 = vsel %vm211_vm1, %v3322_v44, 0.0 }
 0x112   :  { %263 = vadd.xlane.f32.xlu1 %v262_v36  ;;  %v251_v46 = vmul.f32 %v3316_v41, %v3316_v41  ;;  %v230_v50 = vsel %vm211_vm1, %v3316_v41, 0.0  ;;  %2385 = vmatpush1.bf16.msra.mxu0 %v2384_v12 }
 0x113   :  { %222 = vadd.xlane.f32.xlu0 %v221_v39  ;;  %v274_v51 = vsel %vm211_vm1, %v252_v49, 0.0  ;;  %2914 = vmatpush1.bf16.msra.mxu1 %v2384_v12 }
 0x114   :  { %v271_v48 = vsel %vm211_vm1, %v251_v46, 0.0  ;;  %520 = vmatprep.subr.mxu0 %v436_v13  ;;  %2910 = vmatprep.subr.mxu1 %v436_v13 }
 0x116   :  { %266 = vadd.xlane.f32.xlu1 %v265_v40  ;;  %521 = vmatpush1.msra.mxu0 %v435_v18 }
 0x117   :  { %225 = vadd.xlane.f32.xlu0 %v224_v43  ;;  %2915 = vmatpush1.msra.mxu1 %v435_v18 }
 0x118   :  { %2387 = vmatprep.subr.bf16.mxu0 %v2386_v19  ;;  %2403 = vmatprep.subr.bf16.mxu1 %v2402_v25 }
 0x11a   :  { %269 = vadd.xlane.f32.xlu1 %v268_v45 }
 0x11b   :  { %228 = vadd.xlane.f32.xlu0 %v227_v47 }
 0x11e   :  { %272 = vadd.xlane.f32.xlu1 %v271_v48 }
 0x11f   :  { %231 = vadd.xlane.f32.xlu0 %v230_v50 }
 0x122   :  { %275 = vadd.xlane.f32.xlu1 %v274_v51 }
 0x123   :  { %234 = vadd.xlane.f32.xlu0 %v233_v52 }
 0x193   :  { %v217_v26 = vpop.xlane.xlu1 %216 }
 0x194   :  { %v238_v27 = vmul.f32 0.013888889, %v217_v26  ;;  %v214_v28 = vpop.xlane.xlu0 %213 }
 0x195   :  { %v237_v29 = vmul.f32 0.013888889, %v214_v28 }
 0x196   :  { %v294_v31 = vmul.f32 %v238_v27, %v238_v27  ;;  %v286_v61 = vsub.f32 %v3281_v14, %v238_v27 }
 0x197   :  { %v258_v30 = vpop.xlane.xlu1 %257  ;;  %v293_v36 = vmul.f32 %v237_v29, %v237_v29  ;;  %v285_v2 = vsub.f32 %v3283_v16, %v237_v29 }
 0x198   :  { %v278_v32 = vmul.f32 0.013888889, %v258_v30  ;;  %v255_v34 = vpop.xlane.xlu0 %254 }
 0x199   :  { %v277_v37 = vmul.f32 0.013888889, %v255_v34 }
 0x19a   :  { %v302_v38 = vsub.f32 %v278_v32, %v294_v31 }
 0x19b   :  { %v301_v39 = vsub.f32 %v277_v37, %v293_v36  ;;  %v261_v40 = vpop.xlane.xlu1 %260 }
 0x19c   :  { %v310_v42 = vadd.f32 1e-05, %v302_v38  ;;  %v220_v43 = vpop.xlane.xlu0 %219  ;;  %v279_v47 = vmul.f32 0.013888889, %v261_v40 }
 0x19d   :  { %v309_v45 = vadd.f32 1e-05, %v301_v39  ;;  %v239_v46 = vmul.f32 0.013888889, %v220_v43 }
 0x19e   :  { %2981 = vrsqrt.f32 %v310_v42 }
 0x19f   :  { %2983 = vrsqrt.f32 %v309_v45  ;;  %v295_v48 = vmul.f32 %v239_v46, %v239_v46  ;;  %v264_v49 = vpop.xlane.xlu1 %263  ;;  %v287_v25 = vsub.f32 %v3295_v24, %v239_v46 }
 0x1a0   :  { %v223_v50 = vpop.xlane.xlu0 %222  ;;  %v280_v53 = vmul.f32 0.013888889, %v264_v49 }
 0x1a1   :  { %v303_v51 = vsub.f32 %v279_v47, %v295_v48  ;;  %v240_v52 = vmul.f32 0.013888889, %v223_v50  ;;  %v373_v47 = vld [vmem:[#allocation2 + $0x10] sm:$0xff] }
 0x1a2   :  { %v381_v48 = vld [vmem:[#allocation2 + $0x50] sm:$0xff] }
 0x1a3   :  { %v311_v54 = vadd.f32 1e-05, %v303_v51  ;;  %v296_v55 = vmul.f32 %v240_v52, %v240_v52  ;;  %v267_v56 = vpop.xlane.xlu1 %266  ;;  %v288_v24 = vsub.f32 %v3293_v22, %v240_v52  ;;  %v390_v51 = vld [vmem:[#allocation2 + $0x98] sm:$0xff] }
 0x1a4   :  { %v226_v57 = vpop.xlane.xlu0 %225  ;;  %v281_v60 = vmul.f32 0.013888889, %v267_v56  ;;  %v398_v22 = vld [vmem:[#allocation2 + $0xd8] sm:$0xff] }
 0x1a5   :  { %2985 = vrsqrt.f32 %v311_v54  ;;  %v304_v58 = vsub.f32 %v280_v53, %v296_v55  ;;  %v3339_v59 = vmul.f32 0.013888889, %v226_v57  ;;  %v2388_v54 = vpack.c.bf16 %v381_v48, %v373_v47  ;;  %v407_v47 = vld [vmem:[#allocation2 + $0x120] sm:$0xff] }
 0x1a6   :  { %v415_v48 = vld [vmem:[#allocation2 + $0x160] sm:$0xff] }
 0x1a7   :  { %v312_v62 = vadd.f32 1e-05, %v304_v58  ;;  %v297_v63 = vmul.f32 %v3339_v59, %v3339_v59  ;;  %v270_v0 = vpop.xlane.xlu1 %269  ;;  %v289_v46 = vsub.f32 %v3306_v33, %v3339_v59  ;;  %v389_v58 = vld [vmem:[#allocation2 + $0x90] sm:$0xff]  ;;  %v2390_v59 = vpack.c.bf16 %v398_v22, %v390_v51  ;;  %v424_v51 = vld [vmem:[#allocation2 + $0x1a8] sm:$0xff]  ;;  %v378_v22 = vld [vmem:[#allocation2 + $0x38] sm:$0xff] }
 0x1a8   :  { %v2982_v1 = vpop.eup %2981  ;;  %v229_v3 = vpop.xlane.xlu0 %228  ;;  %v282_v4 = vmul.f32 0.013888889, %v270_v0  ;;  %v397_v33 = vld [vmem:[#allocation2 + $0xd0] sm:$0xff] }
 0x1a9   :  { %v2984_v5 = vpop.eup %2983  ;;  %v326_v7 = vmul.f32 %v2982_v1, %v286_v61  ;;  %2987 = vrsqrt.f32 %v312_v62  ;;  %v305_v8 = vsub.f32 %v281_v60, %v297_v63  ;;  %v3350_v14 = vmul.f32 0.013888889, %v229_v3  ;;  %v406_v62 = vld [vmem:[#allocation2 + $0x118] sm:$0xff] }
 0x1aa   :  { %v325_v9 = vmul.f32 %v2984_v5, %v285_v2  ;;  %v414_v63 = vld [vmem:[#allocation2 + $0x158] sm:$0xff]  ;;  %v2392_v1 = vpack.c.bf16 %v397_v33, %v389_v58  ;;  %v413_v5 = vld [vmem:[#allocation2 + $0x150] sm:$0xff]  ;;  %v431_v33 = vld [vmem:[#allocation2 + $0x1e0] sm:$0xff] }
 0x1ab   :  { %v313_v16 = vadd.f32 1e-05, %v305_v8  ;;  %v298_v11 = vmul.f32 %v3350_v14, %v3350_v14  ;;  %v273_v12 = vpop.xlane.xlu1 %272  ;;  %v341_v13 = vmul.f32 %v3348_v6, %v326_v7  ;;  %v290_v57 = vsub.f32 %v3308_v35, %v3350_v14 }
 0x1ac   :  { %v340_v15 = vmul.f32 %v3348_v6, %v325_v9  ;;  %v232_v17 = vpop.xlane.xlu0 %231  ;;  %v283_v21 = vmul.f32 0.013888889, %v273_v12  ;;  %v2394_v7 = vpack.c.bf16 %v414_v63, %v406_v62  ;;  %v422_v9 = vld [vmem:[#allocation2 + $0x198] sm:$0xff]  ;;  %v393_v63 = vld [vmem:[#allocation2 + $0xb0] sm:$0xff] }
 0x1ad   :  { %2989 = vrsqrt.f32 %v313_v16  ;;  %v306_v18 = vsub.f32 %v282_v4, %v298_v11  ;;  %v3361_v19 = vmul.f32 0.013888889, %v232_v17  ;;  %v356_v30 = vadd.f32 %v3355_v10, %v341_v13  ;;  %v405_v4 = vld [vmem:[#allocation2 + $0x110] sm:$0xff]  ;;  %v430_v16 = vld [vmem:[#allocation2 + $0x1d8] sm:$0xff]  ;;  %v383_v13 = vld [vmem:[#allocation2 + $0x60] sm:$0xff] }
 0x1ae   :  { %v355_v23 = vadd.f32 %v3355_v10, %v340_v15  ;;  %v2396_v12 = vpack.c.bf16 %v413_v5, %v405_v4  ;;  %v402_v62 = vld [vmem:[#allocation2 + $0xf8] sm:$0xff] }
 0x1af   :  { %v2986_v26 = vpop.eup %2985  ;;  %v314_v27 = vadd.f32 1e-05, %v306_v18  ;;  %v299_v28 = vmul.f32 %v3361_v19, %v3361_v19  ;;  %v276_v29 = vpop.xlane.xlu1 %275  ;;  %v291_v35 = vsub.f32 %v3316_v41, %v3361_v19  ;;  %v375_v41 = vld [vmem:[#allocation2 + $0x20] sm:$0xff]  ;;  %v392_v19 = vld [vmem:[#allocation2 + $0xa8] sm:$0xff]  ;;  %v410_v4 = vld [vmem:[#allocation2 + $0x138] sm:$0xff] }
 0x1b0   :  { %2991 = vtanh.f32 %v355_v23  ;;  %v327_v31 = vmul.f32 %v2986_v26, %v287_v25  ;;  %v235_v32 = vpop.xlane.xlu0 %234  ;;  %v284_v37 = vmul.f32 0.013888889, %v276_v29  ;;  %v2398_v23 = vpack.c.bf16 %v430_v16, %v422_v9  ;;  %v421_v25 = vld [vmem:[#allocation2 + $0x190] sm:$0xff]  ;;  %v418_v5 = vld [vmem:[#allocation2 + $0x178] sm:$0xff] }
 0x1b1   :  { %2993 = vrsqrt.f32 %v314_v27  ;;  %v307_v34 = vsub.f32 %v283_v21, %v299_v28  ;;  %v3368_v36 = vmul.f32 0.013888889, %v235_v32  ;;  %v400_v21 = vld [vmem:[#allocation2 + $0xe8] sm:$0xff]  ;;  %v429_v26 = vld [vmem:[#allocation2 + $0x1d0] sm:$0xff]  ;;  %v2404_v29 = vpack.c.bf16 %v383_v13, %v375_v41  ;;  %v399_v32 = vld [vmem:[#allocation2 + $0xe0] sm:$0xff] }
 0x1b2   :  { %v342_v38 = vmul.f32 %v3348_v6, %v327_v31  ;;  %2995 = vtanh.f32 %v356_v30  ;;  %v391_v31 = vld [vmem:[#allocation2 + $0xa0] sm:$0xff]  ;;  %v417_v9 = vld [vmem:[#allocation2 + $0x170] sm:$0xff]  ;;  %v2426_v16 = vpack.c.bf16 %v418_v5, %v410_v4  ;;  %v426_v13 = vld [vmem:[#allocation2 + $0x1b8] sm:$0xff] }
 0x1b3   :  { %v2988_v39 = vpop.eup %2987  ;;  %v315_v40 = vadd.f32 1e-05, %v307_v34  ;;  %v300_v42 = vmul.f32 %v3368_v36, %v3368_v36  ;;  %v292_v18 = vsub.f32 %v3322_v44, %v3368_v36  ;;  %v2406_v44 = vpack.c.bf16 %v400_v21, %v392_v19  ;;  %v966_v4 = vld [vmem:[#allocation4 + $0xf0] sm:$0xff] }
 0x1b4   :  { %v357_v43 = vadd.f32 %v3355_v10, %v342_v38  ;;  %v328_v45 = vmul.f32 %v2988_v39, %v288_v24  ;;  %v2400_v38 = vpack.c.bf16 %v429_v26, %v421_v25  ;;  %v408_v24 = vld [vmem:[#allocation2 + $0x128] sm:$0xff]  ;;  %v441_v25 = vld [vmem:[#allocation2 + $0x230] sm:$0xff]  ;;  %v939_v26 = vld [vmem:[#allocation4 + $0x18] sm:$0xff] }
 0x1b5   :  { %2997 = vrsqrt.f32 %v315_v40  ;;  %v308_v49 = vsub.f32 %v284_v37, %v300_v42  ;;  %v416_v39 = vld [vmem:[#allocation2 + $0x168] sm:$0xff]  ;;  %v438_v42 = vld [vmem:[#allocation2 + $0x218] sm:$0xff] }
 0x1b6   :  { %v343_v50 = vmul.f32 %v3348_v6, %v328_v45  ;;  %2999 = vtanh.f32 %v357_v43  ;;  %v2408_v43 = vpack.c.bf16 %v399_v32, %v391_v31  ;;  %v437_v45 = vld [vmem:[#allocation2 + $0x210] sm:$0xff] }
 0x1b7   :  { %v2990_v52 = vpop.eup %2989  ;;  %v316_v53 = vadd.f32 1e-05, %v308_v49  ;;  %v938_v32 = vld [vmem:[#allocation4 + $0x10] sm:$0xff] }
 0x1b8   :  { %v358_v55 = vadd.f32 %v3355_v10, %v343_v50  ;;  %v329_v56 = vmul.f32 %v2990_v52, %v289_v46  ;;  %v2410_v46 = vpack.c.bf16 %v416_v39, %v408_v24  ;;  %v386_v52 = vld [vmem:[#allocation2 + $0x78] sm:$0xff] }
 0x1b9   :  { %3001 = vrsqrt.f32 %v316_v53  ;;  %v377_v53 = vld [vmem:[#allocation2 + $0x30] sm:$0xff]  ;;  %v947_v24 = vld [vmem:[#allocation4 + $0x58] sm:$0xff] }
 0x1ba   :  { %v3381_v60 = vpop.eup %2991  ;;  %3003 = vtanh.f32 %v358_v55  ;;  %v344_v61 = vmul.f32 %v3348_v6, %v329_v56  ;;  %v2412_v55 = vpack.c.bf16 %v415_v48, %v407_v47  ;;  %v423_v56 = vld [vmem:[#allocation2 + $0x1a0] sm:$0xff]  ;;  %v946_v47 = vld [vmem:[#allocation4 + $0x50] sm:$0xff] }
 0x1bb   :  { %v2994_v0 = vpop.eup %2993  ;;  %2252 = vmatmul.mubr.msk.f32.vlgmr.msra.gmra.mrb[8].mxu0 %vm211_vm1, %v3381_v60  ;;  %v950_v48 = vld [vmem:[#allocation4 + $0x70] sm:$0xff] }
 0x1bc   :  { %v359_v2 = vadd.f32 %v3355_v10, %v344_v61  ;;  %v330_v3 = vmul.f32 %v2994_v0, %v290_v57  ;;  %2389 = vmatpush1.bf16.msra.mxu0 %v2388_v54  ;;  %573 = vmatprep.mubr.f32.mxu0 %v3155_v20  ;;  %v3390_v8 = vpop.eup %2995  ;;  %v385_v54 = vld [vmem:[#allocation2 + $0x70] sm:$0xff]  ;;  %v2418_v57 = vpack.c.bf16 %v386_v52, %v378_v22  ;;  %v394_v61 = vld [vmem:[#allocation2 + $0xb8] sm:$0xff] }
 0x1bd   :  { %2391 = vmatprep.subr.bf16.mxu0 %v2390_v59  ;;  %v2420_v59 = vpack.c.bf16 %v385_v54, %v377_v53  ;;  %v401_v0 = vld [vmem:[#allocation2 + $0xf0] sm:$0xff]  ;;  %v955_v22 = vld [vmem:[#allocation4 + $0x98] sm:$0xff]  ;;  %v952_v53 = vld [vmem:[#allocation4 + $0x80] sm:$0xff] }
 0x1be   :  { %3005 = vtanh.f32 %v359_v2  ;;  %v345_v14 = vmul.f32 %v3348_v6, %v330_v3  ;;  %v2422_v2 = vpack.c.bf16 %v402_v62, %v394_v61  ;;  %v956_v54 = vld [vmem:[#allocation4 + $0xa0] sm:$0xff]  ;;  %v963_v61 = vld [vmem:[#allocation4 + $0xd8] sm:$0xff] }
 0x1bf   :  { %v2998_v11 = vpop.eup %2997  ;;  %2253 = vmatmul.mubr.msk.f32.gmra.mrb[10].mxu0 %vm211_vm1, %v3390_v8 }
 0x1c0   :  { %v360_v15 = vadd.f32 %v3355_v10, %v345_v14  ;;  %v331_v17 = vmul.f32 %v2998_v11, %v291_v35  ;;  %2393 = vmatpush1.bf16.msra.mxu0 %v2392_v1  ;;  %579 = vmatprep.mubr.f32.mxu0 %v3155_v20  ;;  %v3399_v27 = vpop.eup %2999  ;;  %v2416_v1 = vpack.c.bf16 %v431_v33, %v423_v56  ;;  %v409_v14 = vld [vmem:[#allocation2 + $0x130] sm:$0xff]  ;;  %v961_v33 = vld [vmem:[#allocation4 + $0xc8] sm:$0xff] }
 0x1c1   :  { %2395 = vmatprep.subr.bf16.mxu0 %v2394_v7  ;;  %v2424_v35 = vpack.c.bf16 %v401_v0, %v393_v63  ;;  %v440_v7 = vld [vmem:[#allocation2 + $0x228] sm:$0xff]  ;;  %v2428_v41 = vpack.c.bf16 %v417_v9, %v409_v14  ;;  %v3533_v56 = vpack.c.bf16 %v956_v54, %v952_v53  ;;  %v967_v63 = vld [vmem:[#allocation4 + $0xf8] sm:$0xff]  ;;  %v960_v0 = vld [vmem:[#allocation4 + $0xc0] sm:$0xff] }
 0x1c2   :  { %3007 = vtanh.f32 %v360_v15  ;;  %v346_v28 = vmul.f32 %v3348_v6, %v331_v17  ;;  %v434_v15 = vld [vmem:[#allocation2 + $0x1f8] sm:$0xff]  ;;  %v425_v17 = vld [vmem:[#allocation2 + $0x1b0] sm:$0xff]  ;;  %v973_v14 = vld [vmem:[#allocation4 + $0x128] sm:$0xff] }
 0x1c3   :  { %v3002_v30 = vpop.eup %3001  ;;  %2254 = vmatmul.mubr.msk.f32.gmra.mrb[12].mxu0 %vm211_vm1, %v3399_v27  ;;  %v2430_v19 = vpack.c.bf16 %v434_v15, %v426_v13  ;;  %v971_v9 = vld [vmem:[#allocation4 + $0x118] sm:$0xff]  ;;  %v993_v54 = vld [vmem:[#allocation4 + $0x1c8] sm:$0xff] }
 0x1c4   :  { %v3404_v34 = vpop.eup %3003  ;;  %v361_v36 = vadd.f32 %v3355_v10, %v346_v28  ;;  %v332_v37 = vmul.f32 %v3002_v30, %v292_v18  ;;  %2397 = vmatpush1.bf16.msra.mxu0 %v2396_v12  ;;  %680 = vmatprep.mubr.f32.mxu0 %v3155_v20  ;;  %v439_v12 = vld [vmem:[#allocation2 + $0x220] sm:$0xff]  ;;  %v433_v18 = vld [vmem:[#allocation2 + $0x1f0] sm:$0xff]  ;;  %v943_v28 = vld [vmem:[#allocation4 + $0x38] sm:$0xff] }
 0x1c5   :  { %2255 = vmatmul.mubr.msk.f32.vlgmr.msra.gmra.mrb[0].mxu1 %vm211_vm1, %v3404_v34  ;;  %2399 = vmatprep.subr.bf16.mxu0 %v2398_v23  ;;  %v2432_v21 = vpack.c.bf16 %v433_v18, %v425_v17  ;;  %v442_v23 = vld [vmem:[#allocation2 + $0x238] sm:$0xff]  ;;  %v940_v30 = vld [vmem:[#allocation4 + $0x20] sm:$0xff]  ;;  %v970_v17 = vld [vmem:[#allocation4 + $0x110] sm:$0xff] }
 0x1c6   :  { %3009 = vtanh.f32 %v361_v36  ;;  %v347_v40 = vmul.f32 %v3348_v6, %v332_v37  ;;  %591 = vmatprep.mubr.f32.mxu1 %v3155_v20  ;;  %2405 = vmatpush1.bf16.msra.mxu1 %v2404_v29  ;;  %v432_v6 = vld [vmem:[#allocation2 + $0x1e8] sm:$0xff]  ;;  %v936_v29 = vld [vmem:[#allocation4] sm:$0xff]  ;;  %v974_v18 = vld [vmem:[#allocation4 + $0x130] sm:$0xff] }
 0x1c7   :  { %2407 = vmatprep.subr.bf16.mxu1 %v2406_v44  ;;  %v2414_v58 = vpack.c.bf16 %v432_v6, %v424_v51  ;;  %v3507_v44 = vpack.c.bf16 %v943_v28, %v939_v26  ;;  %v3509_v31 = vpack.c.bf16 %v940_v30, %v936_v29  ;;  %v945_v37 = vld [vmem:[#allocation4 + $0x48] sm:$0xff]  ;;  %v959_v6 = vld [vmem:[#allocation4 + $0xb8] sm:$0xff]  ;;  %v976_v26 = vld [vmem:[#allocation4 + $0x140] sm:$0xff] }
 0x1c8   :  { %v3412_v49 = vpop.eup %3005  ;;  %v362_v50 = vadd.f32 %v3355_v10, %v347_v40  ;;  %2401 = vmatpush1.bf16.msra.mxu0 %v2400_v38  ;;  %v949_v38 = vld [vmem:[#allocation4 + $0x68] sm:$0xff]  ;;  %v951_v40 = vld [vmem:[#allocation4 + $0x78] sm:$0xff]  ;;  %v980_v28 = vld [vmem:[#allocation4 + $0x160] sm:$0xff] }
 0x1c9   :  { %2256 = vmatmul.mubr.msk.f32.gmra.mrb[2].mxu1 %vm211_vm1, %v3412_v49  ;;  %632 = vmatprep.subr.mxu0 %v438_v42  ;;  %v3517_v39 = vpack.c.bf16 %v949_v38, %v945_v37  ;;  %v944_v42 = vld [vmem:[#allocation4 + $0x40] sm:$0xff]  ;;  %v957_v51 = vld [vmem:[#allocation4 + $0xa8] sm:$0xff]  ;;  %v3569_v30 = vpack.c.bf16 %v980_v28, %v976_v26 }
 0x1ca   :  { %3011 = vtanh.f32 %v362_v50  ;;  %597 = vmatprep.mubr.f32.mxu1 %v3155_v20  ;;  %2409 = vmatpush1.bf16.msra.mxu1 %v2408_v43  ;;  %v948_v43 = vld [vmem:[#allocation4 + $0x60] sm:$0xff]  ;;  %v953_v50 = vld [vmem:[#allocation4 + $0x88] sm:$0xff] }
 0x1cb   :  { %2411 = vmatprep.subr.bf16.mxu1 %v2410_v46  ;;  %v3521_v46 = vpack.c.bf16 %v948_v43, %v944_v42  ;;  %v3529_v52 = vpack.c.bf16 %v957_v51, %v953_v50  ;;  %v985_v38 = vld [vmem:[#allocation4 + $0x188] sm:$0xff]  ;;  %v991_v43 = vld [vmem:[#allocation4 + $0x1b8] sm:$0xff] }
 0x1cc   :  { %v3418_v10 = vpop.eup %3007  ;;  %633 = vmatpush1.msra.mxu0 %v437_v45  ;;  %v3519_v45 = vpack.c.bf16 %v951_v40, %v947_v24  ;;  %v989_v24 = vld [vmem:[#allocation4 + $0x1a8] sm:$0xff]  ;;  %v987_v40 = vld [vmem:[#allocation4 + $0x198] sm:$0xff] }
 0x1cd   :  { %2260 = vmatmul.mubr.msk.f32.vlgmr.msra.gmra.mrb[14].mxu0 %vm211_vm1, %v3381_v60  ;;  %2257 = vmatmul.mubr.msk.f32.gmra.mrb[4].mxu1 %vm211_vm1, %v3418_v10  ;;  %v3577_v42 = vpack.c.bf16 %v989_v24, %v985_v38  ;;  %v3579_v50 = vpack.c.bf16 %v991_v43, %v987_v40 }
 0x1ce   :  { %686 = vmatprep.mubr.f32.mxu0 %v3155_v20  ;;  %603 = vmatprep.mubr.f32.mxu1 %v3155_v20 }
 0x1cf   :  { %2413 = vmatpush1.bf16.msra.mxu1 %v2412_v55  ;;  %2419 = vmatprep.subr.bf16.mxu0 %v2418_v57  ;;  %v3531_v55 = vpack.c.bf16 %v959_v6, %v955_v22  ;;  %v954_v57 = vld [vmem:[#allocation4 + $0x90] sm:$0xff] }
 0x1d0   :  { %v3426_v3 = vpop.eup %3009  ;;  %2415 = vmatprep.subr.bf16.mxu1 %v2414_v58  ;;  %2421 = vmatpush1.bf16.msra.mxu0 %v2420_v59  ;;  %v965_v59 = vld [vmem:[#allocation4 + $0xe8] sm:$0xff]  ;;  %v986_v22 = vld [vmem:[#allocation4 + $0x190] sm:$0xff] }
 0x1d1   :  { %2261 = vmatmul.mubr.msk.f32.gmra.mrb[16].mxu0 %vm211_vm1, %v3390_v8  ;;  %2258 = vmatmul.mubr.msk.f32.gmra.mrb[6].mxu1 %vm211_vm1, %v3426_v3  ;;  %v3541_v62 = vpack.c.bf16 %v965_v59, %v961_v33  ;;  %v990_v6 = vld [vmem:[#allocation4 + $0x1b0] sm:$0xff]  ;;  %v999_v59 = vld [vmem:[#allocation4 + $0x1f8] sm:$0xff] }
 0x1d2   :  { %692 = vmatprep.mubr.f32.mxu0 %v3155_v20  ;;  %609 = vmatprep.mubr.f32.mxu1 %v3155_v20  ;;  %v3584_v53 = vpack.c.bf16 %v990_v6, %v986_v22 }
 0x1d3   :  { %2417 = vmatpush1.bf16.msra.mxu1 %v2416_v1  ;;  %2423 = vmatprep.subr.bf16.mxu0 %v2422_v2  ;;  %v964_v1 = vld [vmem:[#allocation4 + $0xe0] sm:$0xff]  ;;  %v3543_v2 = vpack.c.bf16 %v967_v63, %v963_v61 }
 0x1d4   :  { %v3434_v11 = vpop.eup %3011  ;;  %745 = vmatprep.subr.mxu1 %v440_v7  ;;  %2425 = vmatpush1.bf16.msra.mxu0 %v2424_v35  ;;  %v962_v35 = vld [vmem:[#allocation4 + $0xd0] sm:$0xff]  ;;  %v969_v7 = vld [vmem:[#allocation4 + $0x108] sm:$0xff]  ;;  %v992_v61 = vld [vmem:[#allocation4 + $0x1c0] sm:$0xff] }
 0x1d5   :  { %2262 = vmatmul.mubr.msk.f32.gmra.mrb[18].mxu0 %vm211_vm1, %v3399_v27  ;;  %2259 = vmatmul.mubr.msk.f32.gmra.mrb[8].mxu1 %vm211_vm1, %v3434_v11  ;;  %v3548_v5 = vpack.c.bf16 %v966_v4, %v962_v35  ;;  %v996_v63 = vld [vmem:[#allocation4 + $0x1e0] sm:$0xff]  ;;  %v994_v35 = vld [vmem:[#allocation4 + $0x1d0] sm:$0xff] }
 0x1d6   :  { %698 = vmatprep.mubr.f32.mxu0 %v3155_v20  ;;  %793 = vmatprep.mubr.f32.mxu1 %v3155_v20  ;;  %v998_v4 = vld [vmem:[#allocation4 + $0x1f0] sm:$0xff] }
 0x1d7   :  { %746 = vmatpush1.msra.mxu1 %v439_v12  ;;  %2427 = vmatprep.subr.bf16.mxu0 %v2426_v16  ;;  %v3553_v16 = vpack.c.bf16 %v973_v14, %v969_v7  ;;  %v968_v12 = vld [vmem:[#allocation4 + $0x100] sm:$0xff]  ;;  %v3596_v7 = vpack.c.bf16 %v998_v4, %v994_v35  ;;  %v445_v14 = vlaneseq }
 0x1d8   :  { %2429 = vmatpush1.bf16.msra.mxu0 %v2428_v41  ;;  %v972_v41 = vld [vmem:[#allocation4 + $0x120] sm:$0xff] }
 0x1d9   :  { %2263 = vmatmul.mubr.msk.f32.gmra.mrb[20].mxu0 %vm211_vm1, %v3404_v34  ;;  %2268 = vmatmul.mubr.msk.f32.vlgmr.msra.gmra.mrb[10].mxu1 %vm211_vm1, %v3381_v60  ;;  %v3557_v15 = vpack.c.bf16 %v972_v41, %v968_v12 }
 0x1da   :  { %704 = vmatprep.mubr.f32.mxu0 %v3155_v20  ;;  %797 = vmatprep.mubr.f32.mxu1 %v3155_v20 }
 0x1db   :  { %2431 = vmatprep.subr.bf16.mxu0 %v2430_v19  ;;  %v3560_v19 = vpack.c.bf16 %v974_v18, %v970_v17  ;;  %v3609_v17 = vld [vmem:[%s3965_s6] sm:$0xff] }
 0x1dc   :  { %2433 = vmatpush1.bf16.msra.mxu0 %v2432_v21  ;;  %v977_v21 = vld [vmem:[#allocation4 + $0x148] sm:$0xff] }
 0x1dd   :  { %2264 = vmatmul.mubr.msk.f32.gmra.mrb[22].mxu0 %vm211_vm1, %v3412_v49  ;;  %2269 = vmatmul.mubr.msk.f32.gmra.mrb[12].mxu1 %vm211_vm1, %v3390_v8 }
 0x1de   :  { %710 = vmatprep.mubr.f32.mxu0 %v3155_v20  ;;  %801 = vmatprep.mubr.f32.mxu1 %v3155_v20 }
 0x1df   :  { %843 = vmatprep.subr.mxu0 %v442_v23  ;;  %v981_v23 = vld [vmem:[#allocation4 + $0x168] sm:$0xff] }
 0x1e0   :  { %844 = vmatpush1.msra.mxu0 %v441_v25  ;;  %v979_v25 = vld [vmem:[#allocation4 + $0x158] sm:$0xff] }
 0x1e1   :  { %2265 = vmatmul.mubr.msk.f32.gmra.mrb[24].mxu0 %vm211_vm1, %v3418_v10  ;;  %2270 = vmatmul.mubr.msk.f32.gmra.mrb[14].mxu1 %vm211_vm1, %v3399_v27 }
 0x1e2   :  { %716 = vmatprep.mubr.f32.mxu0 %v3155_v20  ;;  %805 = vmatprep.mubr.f32.mxu1 %v3155_v20 }
 0x1e3   :  { %2467 = vmatprep.subr.bf16.mxu0 %v3507_v44 }
 0x1e5   :  { %2266 = vmatmul.mubr.msk.f32.gmra.mrb[26].mxu0 %vm211_vm1, %v3426_v3  ;;  %2271 = vmatmul.mubr.msk.f32.gmra.mrb[16].mxu1 %vm211_vm1, %v3404_v34 }
 0x1e6   :  { %722 = vmatprep.mubr.f32.mxu0 %v3155_v20  ;;  %809 = vmatprep.mubr.f32.mxu1 %v3155_v20 }
 0x1e9   :  { %2267 = vmatmul.mubr.msk.f32.gmra.mrb[28].mxu0 %vm211_vm1, %v3434_v11  ;;  %2272 = vmatmul.mubr.msk.f32.gmra.mrb[18].mxu1 %vm211_vm1, %v3412_v49 }
 0x1ea   :  { %891 = vmatprep.mubr.f32.mxu0 %v3155_v20  ;;  %813 = vmatprep.mubr.f32.mxu1 %v3155_v20 }
 0x1ed   :  { %2276 = vmatmul.mubr.msk.f32.vlgmr.msra.gmra.mrb[30].mxu0 %vm211_vm1, %v3381_v60  ;;  %2273 = vmatmul.mubr.msk.f32.gmra.mrb[20].mxu1 %vm211_vm1, %v3418_v10  ;;  %v937_v60 = vld [vmem:[#allocation4 + $0x8] sm:$0xff] }
 0x1ee   :  { %895 = vmatprep.mubr.f32.mxu0 %v3155_v20  ;;  %817 = vmatprep.mubr.f32.mxu1 %v3155_v20 }
 0x1f1   :  { %2277 = vmatmul.mubr.msk.f32.gmra.mrb[32].mxu0 %vm211_vm1, %v3390_v8  ;;  %2274 = vmatmul.mubr.msk.f32.gmra.mrb[22].mxu1 %vm211_vm1, %v3426_v3  ;;  %v941_v8 = vld [vmem:[#allocation4 + $0x28] sm:$0xff] }
 0x1f2   :  { %899 = vmatprep.mubr.f32.mxu0 %v3155_v20  ;;  %821 = vmatprep.mubr.f32.mxu1 %v3155_v20 }
 0x1f5   :  { %2278 = vmatmul.mubr.msk.f32.gmra.mrb[34].mxu0 %vm211_vm1, %v3399_v27  ;;  %2275 = vmatmul.mubr.msk.f32.gmra.mrb[24].mxu1 %vm211_vm1, %v3434_v11  ;;  %v3505_v27 = vpack.c.bf16 %v941_v8, %v937_v60  ;;  %v3565_v60 = vpack.c.bf16 %v981_v23, %v977_v21  ;;  %v983_v8 = vld [vmem:[#allocation4 + $0x178] sm:$0xff] }
 0x1f6   :  { %903 = vmatprep.mubr.f32.mxu0 %v3155_v20  ;;  %1074 = vmatprep.mubr.f32.mxu1 %v3155_v20  ;;  %v3567_v29 = vpack.c.bf16 %v983_v8, %v979_v25 }
 0x1f7   :  { %2435 = vmatprep.subr.bf16.mxu1 %v3505_v27 }
 0x1f8   :  { %2437 = vmatpush1.bf16.msra.mxu1 %v3509_v31 }
 0x1f9   :  { %2279 = vmatmul.mubr.msk.f32.gmra.mrb[36].mxu0 %vm211_vm1, %v3404_v34  ;;  %v942_v34 = vld [vmem:[#allocation4 + $0x30] sm:$0xff]  ;;  %2439 = vmatprep.subr.bf16.mxu1 %v3517_v39 }
 0x1fa   :  { %907 = vmatprep.mubr.f32.mxu0 %v3155_v20  ;;  %v3512_v36 = vpack.c.bf16 %v942_v34, %v938_v32  ;;  %v978_v32 = vld [vmem:[#allocation4 + $0x150] sm:$0xff] }
 0x1fb   :  { %v982_v34 = vld [vmem:[#allocation4 + $0x170] sm:$0xff] }
 0x1fc   :  { %2469 = vmatpush1.bf16.msra.mxu0 %v3512_v36  ;;  %2441 = vmatpush1.bf16.msra.mxu1 %v3521_v46  ;;  %v3572_v37 = vpack.c.bf16 %v982_v34, %v978_v32 }
 0x1fd   :  { %2280 = vmatmul.mubr.msk.f32.gmra.mrb[38].mxu0 %vm211_vm1, %v3412_v49  ;;  %v3524_v49 = vpack.c.bf16 %v950_v48, %v946_v47  ;;  %2471 = vmatprep.subr.bf16.mxu0 %v3519_v45  ;;  %v984_v47 = vld [vmem:[#allocation4 + $0x180] sm:$0xff] }
 0x1fe   :  { %911 = vmatprep.mubr.f32.mxu0 %v3155_v20  ;;  %2443 = vmatprep.subr.bf16.mxu1 %v3529_v52  ;;  %v988_v48 = vld [vmem:[#allocation4 + $0x1a0] sm:$0xff] }
 0x1ff   :  { %v3581_v51 = vpack.c.bf16 %v988_v48, %v984_v47 }
 0x200   :  { %2473 = vmatpush1.bf16.msra.mxu0 %v3524_v49  ;;  %2445 = vmatpush1.bf16.msra.mxu1 %v3533_v56 }
 0x201   :  { %2281 = vmatmul.mubr.msk.f32.gmra.mrb[40].mxu0 %vm211_vm1, %v3418_v10  ;;  %v958_v10 = vld [vmem:[#allocation4 + $0xb0] sm:$0xff]  ;;  %2475 = vmatprep.subr.bf16.mxu0 %v3531_v55 }
 0x202   :  { %915 = vmatprep.mubr.f32.mxu0 %v3155_v20  ;;  %v3536_v58 = vpack.c.bf16 %v958_v10, %v954_v57  ;;  %2447 = vmatprep.subr.bf16.mxu1 %v3541_v62  ;;  %v997_v57 = vld [vmem:[#allocation4 + $0x1e8] sm:$0xff]  ;;  %v995_v10 = vld [vmem:[#allocation4 + $0x1d8] sm:$0xff] }
 0x203   :  { %v3589_v33 = vpack.c.bf16 %v997_v57, %v993_v54 }
 0x204   :  { %2477 = vmatpush1.bf16.msra.mxu0 %v3536_v58 }
 0x205   :  { %2282 = vmatmul.mubr.msk.f32.gmra.mrb[42].mxu0 %vm211_vm1, %v3426_v3  ;;  %v3545_v3 = vpack.c.bf16 %v964_v1, %v960_v0  ;;  %2479 = vmatprep.subr.bf16.mxu0 %v3543_v2  ;;  %v3591_v0 = vpack.c.bf16 %v999_v59, %v995_v10  ;;  %v3593_v1 = vpack.c.bf16 %v996_v63, %v992_v61 }
 0x206   :  { %919 = vmatprep.mubr.f32.mxu0 %v3155_v20 }
 0x207   :  { %2449 = vmatpush1.bf16.msra.mxu1 %v3545_v3 }
 0x208   :  { %2481 = vmatpush1.bf16.msra.mxu0 %v3548_v5  ;;  %2451 = vmatprep.subr.bf16.mxu1 %v3553_v16 }
 0x209   :  { %2283 = vmatmul.mubr.msk.f32.gmra.mrb[44].mxu0 %vm211_vm1, %v3434_v11  ;;  %v975_v11 = vld [vmem:[#allocation4 + $0x138] sm:$0xff] }
 0x20a   :  { %1145 = vmatprep.mubr.f32.mxu0 %v3155_v20  ;;  %v3555_v13 = vpack.c.bf16 %v975_v11, %v971_v9  ;;  %v3603_v9 = vshrl.u32 %v445_v14, 7 }
 0x20b   :  { %2453 = vmatpush1.bf16.msra.mxu1 %v3557_v15 }
 0x20c   :  { %2483 = vmatprep.subr.bf16.mxu0 %v3555_v13  ;;  %2455 = vmatprep.subr.bf16.mxu1 %v3565_v60  ;;  %v447_v12 = vsub.s32 0, %v3603_v9  ;;  %v455_v28 = vsub.s32 2, %v3603_v9  ;;  %v459_v32 = vsub.s32 3, %v3603_v9 }
 0x20d   :  { %2485 = vmatpush1.bf16.msra.mxu0 %v3560_v19 }
 0x20e   :  { %2487 = vmatprep.subr.bf16.mxu0 %v3567_v29  ;;  %v3614_v21 = vrot.slane %v3609_v17, %v447_v12  ;;  %v3626_v34 = vrot.slane %v3609_v17, %v455_v28  ;;  %v3629_v24 = vrot.slane %v3609_v17, %v459_v32 }
 0x20f   :  { %2457 = vmatpush1.bf16.msra.mxu1 %v3569_v30 }
 0x210   :  { %2459 = vmatprep.subr.bf16.mxu1 %v3577_v42 }
 0x211   :  { %2489 = vmatpush1.bf16.msra.mxu0 %v3572_v37 }
 0x212   :  { %2491 = vmatprep.subr.bf16.mxu0 %v3579_v50 }
 0x213   :  { %2461 = vmatpush1.bf16.msra.mxu1 %v3581_v51 }
 0x214   :  { %2463 = vmatprep.subr.bf16.mxu1 %v3589_v33 }
 0x215   :  { %2493 = vmatpush1.bf16.msra.mxu0 %v3584_v53 }
 0x216   :  { %2495 = vmatprep.subr.bf16.mxu0 %v3591_v0 }
 0x217   :  { %2465 = vmatpush1.bf16.msra.mxu1 %v3593_v1 }
 0x218   :  { %2499 = vmatprep.subr.bf16.mxu1 %v3505_v27 }
 0x219   :  { %2497 = vmatpush1.bf16.msra.mxu0 %v3596_v7 }
 0x21a   :  { %2531 = vmatprep.subr.bf16.mxu0 %v3507_v44 }
 0x28e   :  { %v570_v11 = vpop.f32.mrb[8].mxu0 }
 0x28f   :  { %v572_v41 = vpop.f32.mrb[9].mxu0  ;;  %v571_v8 = vadd.f32 %v570_v11, %v3614_v21 }
 0x291   :  { %3013 = vtanh.f32 %v571_v8 }
 0x292   :  { %v3611_v18 = vpop.f32.mrb[10].mxu0 }
 0x293   :  { %v3616_v23 = vpop.f32.mrb[11].mxu0 }
 0x296   :  { %v3618_v25 = vpop.f32.mrb[12].mxu0 }
 0x297   :  { %v3621_v26 = vpop.f32.mrb[13].mxu0 }
 0x29b   :  { %v3014_v48 = vpop.eup %3013 }
 0x29c   :  { %v1003_v22 = vmul.f32 0.5, %v3014_v48 }
 0x29e   :  { %v1004_v6 = vadd.f32 0.5, %v1003_v22 }
 0x2a0   :  { %v682_v38 = vpop.f32.mrb[14].mxu0 }
 0x2a1   :  { %v683_v40 = vadd.f32 %v682_v38, %v3626_v34  ;;  %v684_v43 = vpop.f32.mrb[15].mxu0 }
 0x2a2   :  { %v685_v47 = vadd.f32 %v684_v43, %v3629_v24 }
 0x2a3   :  { %3015 = vtanh.f32 %v683_v40 }
 0x2a4   :  { %3017 = vtanh.f32 %v685_v47 }
 0x2ac   :  { %v795_v54 = vpop.f32.mrb[10].mxu1 }
 0x2ad   :  { %v3016_v57 = vpop.eup %3015  ;;  %v796_v10 = vpop.f32.mrb[11].mxu1 }
 0x2ae   :  { %v3633_v59 = vmul.f32 %v3016_v57, %v1004_v6  ;;  %v3018_v35 = vpop.eup %3017 }
 0x2af   :  { %v1005_v14 = vmul.f32 0.5, %v3018_v35 }
 0x2b0   :  { %3019 = vtanh.f32 %v3633_v59  ;;  %v799_v61 = vpop.f32.mrb[12].mxu1 }
 0x2b1   :  { %v800_v63 = vpop.f32.mrb[13].mxu1  ;;  %v1006_v41 = vadd.f32 0.5, %v1005_v14  ;;  %v463_v14 = vsub.s32 4, %v3603_v9 }
 0x2b4   :  { %v803_v4 = vpop.f32.mrb[14].mxu1 }
 0x2b5   :  { %v804_v11 = vpop.f32.mrb[15].mxu1 }
 0x2b8   :  { %v807_v12 = vpop.f32.mrb[16].mxu1 }
 0x2b9   :  { %v808_v8 = vpop.f32.mrb[17].mxu1 }
 0x2ba   :  { %v3020_v28 = vpop.eup %3019 }
 0x2bb   :  { %v1009_v32 = vmul.f32 %v3020_v28, %v1006_v41  ;;  %v464_v41 = vrot.slane %v3609_v17, %v463_v14 }
 0x2bc   :  { %v811_v38 = vpop.f32.mrb[18].mxu1 }
 0x2bd   :  { %1075 = vmatmul.mubr.f32.vlgmr.msra.gmra.mrb[26].mxu1 %v1009_v32  ;;  %1146 = vmatmul.mubr.f32.vlgmr.msra.gmra.mrb[16].mxu0 %v1009_v32  ;;  %v812_v40 = vpop.f32.mrb[19].mxu1 }
 0x2be   :  { %2501 = vmatpush1.bf16.msra.mxu1 %v3509_v31  ;;  %2533 = vmatpush1.bf16.msra.mxu0 %v3512_v36 }
 0x2bf   :  { %2503 = vmatprep.subr.bf16.mxu1 %v3517_v39  ;;  %2535 = vmatprep.subr.bf16.mxu0 %v3519_v45 }
 0x2c0   :  { %v893_v43 = vpop.f32.mrb[30].mxu0  ;;  %v815_v47 = vpop.f32.mrb[20].mxu1  ;;  %1235 = vmatprep.mubr.f32.mxu1 %v3155_v20  ;;  %1306 = vmatprep.mubr.f32.mxu0 %v3155_v20 }
 0x2c1   :  { %v894_v48 = vpop.f32.mrb[31].mxu0  ;;  %v816_v22 = vpop.f32.mrb[21].mxu1  ;;  %v467_v43 = vsub.s32 6, %v3603_v9 }
 0x2c2   :  { %2505 = vmatpush1.bf16.msra.mxu1 %v3521_v46  ;;  %2537 = vmatpush1.bf16.msra.mxu0 %v3524_v49  ;;  %v471_v48 = vsub.s32 7, %v3603_v9 }
 0x2c3   :  { %2507 = vmatprep.subr.bf16.mxu1 %v3529_v52  ;;  %2539 = vmatprep.subr.bf16.mxu0 %v3531_v55 }
 0x2c4   :  { %v897_v6 = vpop.f32.mrb[32].mxu0  ;;  %v819_v54 = vpop.f32.mrb[22].mxu1 }
 0x2c5   :  { %v898_v57 = vpop.f32.mrb[33].mxu0  ;;  %v820_v10 = vpop.f32.mrb[23].mxu1  ;;  %v468_v6 = vrot.slane %v3609_v17, %v467_v43 }
 0x2c6   :  { %2509 = vmatpush1.bf16.msra.mxu1 %v3533_v56  ;;  %2541 = vmatpush1.bf16.msra.mxu0 %v3536_v58  ;;  %v472_v57 = vrot.slane %v3609_v17, %v471_v48 }
 0x2c7   :  { %2511 = vmatprep.subr.bf16.mxu1 %v3541_v62  ;;  %2543 = vmatprep.subr.bf16.mxu0 %v3543_v2 }
 0x2c8   :  { %v901_v61 = vpop.f32.mrb[34].mxu0  ;;  %v823_v63 = vpop.f32.mrb[24].mxu1 }
 0x2c9   :  { %v902_v35 = vpop.f32.mrb[35].mxu0  ;;  %v825_v4 = vpop.f32.mrb[25].mxu1  ;;  %v824_v32 = vadd.f32 %v823_v63, %v464_v41 }
 0x2ca   :  { %2513 = vmatpush1.bf16.msra.mxu1 %v3545_v3  ;;  %2545 = vmatpush1.bf16.msra.mxu0 %v3548_v5 }
 0x2cb   :  { %2515 = vmatprep.subr.bf16.mxu1 %v3553_v16  ;;  %2547 = vmatprep.subr.bf16.mxu0 %v3555_v13  ;;  %3021 = vtanh.f32 %v824_v32 }
 0x2cc   :  { %v905_v11 = vpop.f32.mrb[36].mxu0 }
 0x2cd   :  { %v906_v12 = vpop.f32.mrb[37].mxu0 }
 0x2ce   :  { %2517 = vmatpush1.bf16.msra.mxu1 %v3557_v15  ;;  %2549 = vmatpush1.bf16.msra.mxu0 %v3560_v19 }
 0x2cf   :  { %2519 = vmatprep.subr.bf16.mxu1 %v3565_v60  ;;  %2551 = vmatprep.subr.bf16.mxu0 %v3567_v29 }
 0x2d0   :  { %v909_v8 = vpop.f32.mrb[38].mxu0 }
 0x2d1   :  { %v910_v28 = vpop.f32.mrb[39].mxu0 }
 0x2d2   :  { %2521 = vmatpush1.bf16.msra.mxu1 %v3569_v30  ;;  %2553 = vmatpush1.bf16.msra.mxu0 %v3572_v37 }
 0x2d3   :  { %2523 = vmatprep.subr.bf16.mxu1 %v3577_v42  ;;  %2555 = vmatprep.subr.bf16.mxu0 %v3579_v50 }
 0x2d4   :  { %v913_v38 = vpop.f32.mrb[40].mxu0 }
 0x2d5   :  { %v914_v40 = vpop.f32.mrb[41].mxu0  ;;  %v3022_v35 = vpop.eup %3021 }
 0x2d6   :  { %2525 = vmatpush1.bf16.msra.mxu1 %v3581_v51  ;;  %2557 = vmatpush1.bf16.msra.mxu0 %v3584_v53  ;;  %v929_v4 = vmul.f32 0.5, %v3022_v35  ;;  %v451_v40 = vsub.s32 1, %v3603_v9 }
 0x2d7   :  { %2527 = vmatprep.subr.bf16.mxu1 %v3589_v33  ;;  %2559 = vmatprep.subr.bf16.mxu0 %v3591_v0 }
 0x2d8   :  { %v917_v47 = vpop.f32.mrb[42].mxu0  ;;  %v930_v14 = vadd.f32 0.5, %v929_v4  ;;  %v3680_v43 = vrot.slane %v3609_v17, %v451_v40 }
 0x2d9   :  { %v918_v22 = vpop.f32.mrb[43].mxu0  ;;  %v576_v47 = vadd.f32 %v3611_v18, %v3614_v21 }
 0x2da   :  { %2529 = vmatpush1.bf16.msra.mxu1 %v3593_v1  ;;  %2561 = vmatpush1.bf16.msra.mxu0 %v3596_v7  ;;  %v578_v48 = vadd.f32 %v3616_v23, %v3680_v43 }
 0x2db   :  { %2563 = vmatprep.subr.bf16.mxu1 %v3505_v27  ;;  %2595 = vmatprep.subr.bf16.mxu0 %v3507_v44 }
 0x2dc   :  { %v921_v54 = vpop.f32.mrb[44].mxu0 }
 0x2dd   :  { %v922_v10 = vadd.f32 %v921_v54, %v468_v6  ;;  %v923_v61 = vpop.f32.mrb[45].mxu0 }
 0x2de   :  { %v924_v63 = vadd.f32 %v923_v61, %v472_v57 }
 0x2df   :  { %3023 = vtanh.f32 %v922_v10 }
 0x2e0   :  { %3025 = vtanh.f32 %v924_v63 }
 0x2e9   :  { %v3024_v11 = vpop.eup %3023 }
 0x2ea   :  { %v933_v12 = vmul.f32 %v3024_v11, %v930_v14  ;;  %v3026_v41 = vpop.eup %3025 }
 0x2eb   :  { %v931_v8 = vmul.f32 0.5, %v3026_v41 }
 0x2ec   :  { %3027 = vtanh.f32 %v933_v12 }
 0x2ed   :  { %v932_v28 = vadd.f32 0.5, %v931_v8 }
 0x2f6   :  { %v3028_v32 = vpop.eup %3027 }
 0x2f7   :  { %v3676_v38 = vmul.f32 %v3028_v32, %v932_v28 }
 0x390   :  { %v1076_v22 = vpop.f32.mrb[26].mxu1  ;;  %v1147_v6 = vpop.f32.mrb[16].mxu0 }
 0x391   :  { %v1152_v54 = vadd.f32 %v1076_v22, %v576_v47  ;;  %v1078_v57 = vpop.f32.mrb[27].mxu1  ;;  %v1149_v10 = vpop.f32.mrb[17].mxu0  ;;  %v2934_v63 = vadd.f32 %v1147_v6, %v3626_v34  ;;  %v584_v22 = vadd.f32 %v3621_v26, %v3680_v43 }
 0x392   :  { %v1153_v61 = vadd.f32 %v1078_v57, %v578_v48  ;;  %v2935_v9 = vadd.f32 %v1149_v10, %v3629_v24 }
 0x393   :  { %3029 = vtanh.f32 %v1152_v54 }
 0x394   :  { %3031 = vtanh.f32 %v1153_v61 }
 0x395   :  { %3033 = vtanh.f32 %v2934_v63 }
 0x396   :  { %3035 = vtanh.f32 %v2935_v9 }
 0x39d   :  { %v3030_v17 = vpop.eup %3029 }
 0x39e   :  { %v1160_v35 = vmul.f32 0.5, %v3030_v17  ;;  %v3032_v4 = vpop.eup %3031 }
 0x39f   :  { %v1162_v14 = vmul.f32 0.5, %v3032_v4  ;;  %v3034_v23 = vpop.eup %3033 }
 0x3a0   :  { %v1161_v18 = vadd.f32 0.5, %v1160_v35  ;;  %v3036_v28 = vpop.eup %3035 }
 0x3a1   :  { %v1163_v11 = vadd.f32 0.5, %v1162_v14  ;;  %v1164_v32 = vmul.f32 0.5, %v3036_v28 }
 0x3a2   :  { %v1167_v12 = vmul.f32 %v3034_v23, %v1161_v18 }
 0x3a3   :  { %v1166_v41 = vmul.f32 %v1163_v11, %v3633_v59  ;;  %v1165_v40 = vadd.f32 0.5, %v1164_v32  ;;  %v582_v59 = vadd.f32 %v3618_v25, %v3614_v21 }
 0x3a5   :  { %v3689_v8 = vadd.f32 %v1167_v12, %v1166_v41 }
 0x3a7   :  { %3037 = vtanh.f32 %v3689_v8 }
 0x3b1   :  { %v3038_v47 = vpop.eup %3037 }
 0x3b2   :  { %v1170_v48 = vmul.f32 %v3038_v47, %v1165_v40 }
 0x3b4   :  { %1236 = vmatmul.mubr.f32.vlgmr.msra.gmra.mrb[28].mxu1 %v1170_v48  ;;  %1307 = vmatmul.mubr.f32.vlgmr.msra.gmra.mrb[18].mxu0 %v1170_v48 }
 0x3b5   :  { %2565 = vmatpush1.bf16.msra.mxu1 %v3509_v31  ;;  %2597 = vmatpush1.bf16.msra.mxu0 %v3512_v36 }
 0x3b6   :  { %2567 = vmatprep.subr.bf16.mxu1 %v3517_v39  ;;  %2599 = vmatprep.subr.bf16.mxu0 %v3519_v45 }
 0x3b7   :  { %1396 = vmatprep.mubr.f32.mxu1 %v3155_v20  ;;  %1467 = vmatprep.mubr.f32.mxu0 %v3155_v20 }
 0x3b9   :  { %2569 = vmatpush1.bf16.msra.mxu1 %v3521_v46  ;;  %2601 = vmatpush1.bf16.msra.mxu0 %v3524_v49 }
 0x3ba   :  { %2571 = vmatprep.subr.bf16.mxu1 %v3529_v52  ;;  %2603 = vmatprep.subr.bf16.mxu0 %v3531_v55 }
 0x3bd   :  { %2573 = vmatpush1.bf16.msra.mxu1 %v3533_v56  ;;  %2605 = vmatpush1.bf16.msra.mxu0 %v3536_v58 }
 0x3be   :  { %2575 = vmatprep.subr.bf16.mxu1 %v3541_v62  ;;  %2607 = vmatprep.subr.bf16.mxu0 %v3543_v2 }
 0x3c1   :  { %2577 = vmatpush1.bf16.msra.mxu1 %v3545_v3  ;;  %2609 = vmatpush1.bf16.msra.mxu0 %v3548_v5 }
 0x3c2   :  { %2579 = vmatprep.subr.bf16.mxu1 %v3553_v16  ;;  %2611 = vmatprep.subr.bf16.mxu0 %v3555_v13 }
 0x3c5   :  { %2581 = vmatpush1.bf16.msra.mxu1 %v3557_v15  ;;  %2613 = vmatpush1.bf16.msra.mxu0 %v3560_v19 }
 0x3c6   :  { %2583 = vmatprep.subr.bf16.mxu1 %v3565_v60  ;;  %2615 = vmatprep.subr.bf16.mxu0 %v3567_v29 }
 0x3c9   :  { %2585 = vmatpush1.bf16.msra.mxu1 %v3569_v30  ;;  %2617 = vmatpush1.bf16.msra.mxu0 %v3572_v37 }
 0x3ca   :  { %2587 = vmatprep.subr.bf16.mxu1 %v3577_v42  ;;  %2619 = vmatprep.subr.bf16.mxu0 %v3579_v50 }
 0x3cd   :  { %2589 = vmatpush1.bf16.msra.mxu1 %v3581_v51  ;;  %2621 = vmatpush1.bf16.msra.mxu0 %v3584_v53 }
 0x3ce   :  { %2591 = vmatprep.subr.bf16.mxu1 %v3589_v33  ;;  %2623 = vmatprep.subr.bf16.mxu0 %v3591_v0 }
 0x3d1   :  { %2593 = vmatpush1.bf16.msra.mxu1 %v3593_v1  ;;  %2625 = vmatpush1.bf16.msra.mxu0 %v3596_v7 }
 0x3d2   :  { %2627 = vmatprep.subr.bf16.mxu1 %v3505_v27  ;;  %2659 = vmatprep.subr.bf16.mxu0 %v3507_v44 }
 0x487   :  { %v1237_v6 = vpop.f32.mrb[28].mxu1  ;;  %v1308_v54 = vpop.f32.mrb[18].mxu0 }
 0x488   :  { %v1313_v57 = vadd.f32 %v1237_v6, %v582_v59  ;;  %v1239_v10 = vpop.f32.mrb[29].mxu1  ;;  %v1310_v61 = vpop.f32.mrb[19].mxu0  ;;  %v2936_v9 = vadd.f32 %v1308_v54, %v3626_v34 }
 0x489   :  { %v1314_v63 = vadd.f32 %v1239_v10, %v584_v22  ;;  %v2937_v17 = vadd.f32 %v1310_v61, %v3629_v24 }
 0x48a   :  { %3039 = vtanh.f32 %v1313_v57 }
 0x48b   :  { %3041 = vtanh.f32 %v1314_v63 }
 0x48c   :  { %3043 = vtanh.f32 %v2936_v9 }
 0x48d   :  { %3045 = vtanh.f32 %v2937_v17 }
 0x494   :  { %v3040_v35 = vpop.eup %3039 }
 0x495   :  { %v1321_v4 = vmul.f32 0.5, %v3040_v35  ;;  %v3042_v18 = vpop.eup %3041 }
 0x496   :  { %v1323_v14 = vmul.f32 0.5, %v3042_v18  ;;  %v3044_v26 = vpop.eup %3043 }
 0x497   :  { %v1322_v25 = vadd.f32 0.5, %v1321_v4  ;;  %v3046_v28 = vpop.eup %3045 }
 0x498   :  { %v1324_v23 = vadd.f32 0.5, %v1323_v14  ;;  %v1325_v32 = vmul.f32 0.5, %v3046_v28 }
 0x499   :  { %v1328_v11 = vmul.f32 %v3044_v26, %v1322_v25 }
 0x49a   :  { %v1327_v12 = vmul.f32 %v1324_v23, %v3689_v8  ;;  %v1326_v40 = vadd.f32 0.5, %v1325_v32 }
 0x49c   :  { %v3733_v41 = vadd.f32 %v1328_v11, %v1327_v12 }
 0x49e   :  { %3047 = vtanh.f32 %v3733_v41 }
 0x4a8   :  { %v3048_v47 = vpop.eup %3047 }
 0x4a9   :  { %v1331_v48 = vmul.f32 %v3048_v47, %v1326_v40 }
 0x4ab   :  { %1397 = vmatmul.mubr.f32.vlgmr.msra.gmra.mrb[0].mxu1 %v1331_v48  ;;  %1468 = vmatmul.mubr.f32.vlgmr.msra.gmra.mrb[20].mxu0 %v1331_v48 }
 0x4ac   :  { %2629 = vmatpush1.bf16.msra.mxu1 %v3509_v31  ;;  %2661 = vmatpush1.bf16.msra.mxu0 %v3512_v36 }
 0x4ad   :  { %2631 = vmatprep.subr.bf16.mxu1 %v3517_v39  ;;  %2663 = vmatprep.subr.bf16.mxu0 %v3519_v45 }
 0x4ae   :  { %1557 = vmatprep.mubr.f32.mxu1 %v3155_v20  ;;  %1628 = vmatprep.mubr.f32.mxu0 %v3155_v20 }
 0x4b0   :  { %2633 = vmatpush1.bf16.msra.mxu1 %v3521_v46  ;;  %2665 = vmatpush1.bf16.msra.mxu0 %v3524_v49 }
 0x4b1   :  { %2635 = vmatprep.subr.bf16.mxu1 %v3529_v52  ;;  %2667 = vmatprep.subr.bf16.mxu0 %v3531_v55 }
 0x4b4   :  { %2637 = vmatpush1.bf16.msra.mxu1 %v3533_v56  ;;  %2669 = vmatpush1.bf16.msra.mxu0 %v3536_v58 }
 0x4b5   :  { %2639 = vmatprep.subr.bf16.mxu1 %v3541_v62  ;;  %2671 = vmatprep.subr.bf16.mxu0 %v3543_v2 }
 0x4b8   :  { %2641 = vmatpush1.bf16.msra.mxu1 %v3545_v3  ;;  %2673 = vmatpush1.bf16.msra.mxu0 %v3548_v5 }
 0x4b9   :  { %2643 = vmatprep.subr.bf16.mxu1 %v3553_v16  ;;  %2675 = vmatprep.subr.bf16.mxu0 %v3555_v13 }
 0x4bc   :  { %2645 = vmatpush1.bf16.msra.mxu1 %v3557_v15  ;;  %2677 = vmatpush1.bf16.msra.mxu0 %v3560_v19 }
 0x4bd   :  { %2647 = vmatprep.subr.bf16.mxu1 %v3565_v60  ;;  %2679 = vmatprep.subr.bf16.mxu0 %v3567_v29 }
 0x4c0   :  { %2649 = vmatpush1.bf16.msra.mxu1 %v3569_v30  ;;  %2681 = vmatpush1.bf16.msra.mxu0 %v3572_v37 }
 0x4c1   :  { %2651 = vmatprep.subr.bf16.mxu1 %v3577_v42  ;;  %2683 = vmatprep.subr.bf16.mxu0 %v3579_v50 }
 0x4c4   :  { %2653 = vmatpush1.bf16.msra.mxu1 %v3581_v51  ;;  %2685 = vmatpush1.bf16.msra.mxu0 %v3584_v53 }
 0x4c5   :  { %2655 = vmatprep.subr.bf16.mxu1 %v3589_v33  ;;  %2687 = vmatprep.subr.bf16.mxu0 %v3591_v0 }
 0x4c8   :  { %2657 = vmatpush1.bf16.msra.mxu1 %v3593_v1  ;;  %2689 = vmatpush1.bf16.msra.mxu0 %v3596_v7 }
 0x4c9   :  { %2691 = vmatprep.subr.bf16.mxu1 %v3505_v27  ;;  %2723 = vmatprep.subr.bf16.mxu0 %v3507_v44 }
 0x57e   :  { %v1398_v8 = vpop.f32.mrb[0].mxu1  ;;  %v1469_v59 = vpop.f32.mrb[20].mxu0 }
 0x57f   :  { %v2924_v22 = vadd.f32 %v1398_v8, %v3614_v21  ;;  %v1400_v6 = vpop.f32.mrb[1].mxu1  ;;  %v1471_v54 = vpop.f32.mrb[21].mxu0  ;;  %v2938_v10 = vadd.f32 %v1469_v59, %v3626_v34 }
 0x580   :  { %v2925_v57 = vadd.f32 %v1400_v6, %v3680_v43  ;;  %v2939_v61 = vadd.f32 %v1471_v54, %v3629_v24 }
 0x581   :  { %3049 = vtanh.f32 %v2924_v22 }
 0x582   :  { %3051 = vtanh.f32 %v2925_v57 }
 0x583   :  { %3053 = vtanh.f32 %v2938_v10 }
 0x584   :  { %3055 = vtanh.f32 %v2939_v61 }
 0x58b   :  { %v3050_v63 = vpop.eup %3049 }
 0x58c   :  { %v1482_v9 = vmul.f32 0.5, %v3050_v63  ;;  %v3052_v17 = vpop.eup %3051 }
 0x58d   :  { %v1484_v4 = vmul.f32 0.5, %v3052_v17  ;;  %v3054_v18 = vpop.eup %3053 }
 0x58e   :  { %v1483_v35 = vadd.f32 0.5, %v1482_v9  ;;  %v3056_v11 = vpop.eup %3055 }
 0x58f   :  { %v1485_v25 = vadd.f32 0.5, %v1484_v4  ;;  %v1486_v12 = vmul.f32 0.5, %v3056_v11 }
 0x590   :  { %v1489_v14 = vmul.f32 %v3054_v18, %v1483_v35 }
 0x591   :  { %v1488_v26 = vmul.f32 %v1485_v25, %v3733_v41  ;;  %v1487_v28 = vadd.f32 0.5, %v1486_v12 }
 0x593   :  { %v3775_v23 = vadd.f32 %v1489_v14, %v1488_v26 }
 0x595   :  { %3057 = vtanh.f32 %v3775_v23 }
 0x59f   :  { %v3058_v32 = vpop.eup %3057 }
 0x5a0   :  { %v1492_v40 = vmul.f32 %v3058_v32, %v1487_v28 }
 0x5a2   :  { %1558 = vmatmul.mubr.f32.vlgmr.msra.gmra.mrb[2].mxu1 %v1492_v40  ;;  %1629 = vmatmul.mubr.f32.vlgmr.msra.gmra.mrb[22].mxu0 %v1492_v40 }
 0x5a3   :  { %2693 = vmatpush1.bf16.msra.mxu1 %v3509_v31  ;;  %2725 = vmatpush1.bf16.msra.mxu0 %v3512_v36 }
 0x5a4   :  { %2695 = vmatprep.subr.bf16.mxu1 %v3517_v39  ;;  %2727 = vmatprep.subr.bf16.mxu0 %v3519_v45 }
 0x5a5   :  { %1718 = vmatprep.mubr.f32.mxu1 %v3155_v20  ;;  %1789 = vmatprep.mubr.f32.mxu0 %v3155_v20 }
 0x5a7   :  { %2697 = vmatpush1.bf16.msra.mxu1 %v3521_v46  ;;  %2729 = vmatpush1.bf16.msra.mxu0 %v3524_v49 }
 0x5a8   :  { %2699 = vmatprep.subr.bf16.mxu1 %v3529_v52  ;;  %2731 = vmatprep.subr.bf16.mxu0 %v3531_v55 }
 0x5ab   :  { %2701 = vmatpush1.bf16.msra.mxu1 %v3533_v56  ;;  %2733 = vmatpush1.bf16.msra.mxu0 %v3536_v58 }
 0x5ac   :  { %2703 = vmatprep.subr.bf16.mxu1 %v3541_v62  ;;  %2735 = vmatprep.subr.bf16.mxu0 %v3543_v2 }
 0x5af   :  { %2705 = vmatpush1.bf16.msra.mxu1 %v3545_v3  ;;  %2737 = vmatpush1.bf16.msra.mxu0 %v3548_v5 }
 0x5b0   :  { %2707 = vmatprep.subr.bf16.mxu1 %v3553_v16  ;;  %2739 = vmatprep.subr.bf16.mxu0 %v3555_v13 }
 0x5b3   :  { %2709 = vmatpush1.bf16.msra.mxu1 %v3557_v15  ;;  %2741 = vmatpush1.bf16.msra.mxu0 %v3560_v19 }
 0x5b4   :  { %2711 = vmatprep.subr.bf16.mxu1 %v3565_v60  ;;  %2743 = vmatprep.subr.bf16.mxu0 %v3567_v29 }
 0x5b7   :  { %2713 = vmatpush1.bf16.msra.mxu1 %v3569_v30  ;;  %2745 = vmatpush1.bf16.msra.mxu0 %v3572_v37 }
 0x5b8   :  { %2715 = vmatprep.subr.bf16.mxu1 %v3577_v42  ;;  %2747 = vmatprep.subr.bf16.mxu0 %v3579_v50 }
 0x5bb   :  { %2717 = vmatpush1.bf16.msra.mxu1 %v3581_v51  ;;  %2749 = vmatpush1.bf16.msra.mxu0 %v3584_v53 }
 0x5bc   :  { %2719 = vmatprep.subr.bf16.mxu1 %v3589_v33  ;;  %2751 = vmatprep.subr.bf16.mxu0 %v3591_v0 }
 0x5bf   :  { %2721 = vmatpush1.bf16.msra.mxu1 %v3593_v1  ;;  %2753 = vmatpush1.bf16.msra.mxu0 %v3596_v7 }
 0x5c0   :  { %2755 = vmatprep.subr.bf16.mxu1 %v3505_v27  ;;  %2787 = vmatprep.subr.bf16.mxu0 %v3507_v44 }
 0x675   :  { %v1559_v41 = vpop.f32.mrb[2].mxu1  ;;  %v1630_v47 = vpop.f32.mrb[22].mxu0 }
 0x676   :  { %v2926_v48 = vadd.f32 %v1559_v41, %v3614_v21  ;;  %v1561_v8 = vpop.f32.mrb[3].mxu1  ;;  %v1632_v59 = vpop.f32.mrb[23].mxu0  ;;  %v2940_v6 = vadd.f32 %v1630_v47, %v3626_v34 }
 0x677   :  { %v2927_v22 = vadd.f32 %v1561_v8, %v3680_v43  ;;  %v2941_v54 = vadd.f32 %v1632_v59, %v3629_v24 }
 0x678   :  { %3059 = vtanh.f32 %v2926_v48 }
 0x679   :  { %3061 = vtanh.f32 %v2927_v22 }
 0x67a   :  { %3063 = vtanh.f32 %v2940_v6 }
 0x67b   :  { %3065 = vtanh.f32 %v2941_v54 }
 0x682   :  { %v3060_v57 = vpop.eup %3059 }
 0x683   :  { %v1643_v10 = vmul.f32 0.5, %v3060_v57  ;;  %v3062_v61 = vpop.eup %3061 }
 0x684   :  { %v1645_v9 = vmul.f32 0.5, %v3062_v61  ;;  %v3064_v17 = vpop.eup %3063 }
 0x685   :  { %v1644_v63 = vadd.f32 0.5, %v1643_v10  ;;  %v3066_v14 = vpop.eup %3065 }
 0x686   :  { %v1646_v35 = vadd.f32 0.5, %v1645_v9  ;;  %v1647_v26 = vmul.f32 0.5, %v3066_v14 }
 0x687   :  { %v1650_v4 = vmul.f32 %v3064_v17, %v1644_v63 }
 0x688   :  { %v1649_v18 = vmul.f32 %v1646_v35, %v3775_v23  ;;  %v1648_v11 = vadd.f32 0.5, %v1647_v26  ;;  %v2144_v26 = vld [vmem:[%s3967_s8 + $0x28] sm:$0xff] }
 0x68a   :  { %v3817_v25 = vadd.f32 %v1650_v4, %v1649_v18 }
 0x68c   :  { %3067 = vtanh.f32 %v3817_v25 }
 0x696   :  { %v3068_v12 = vpop.eup %3067 }
 0x697   :  { %v1653_v28 = vmul.f32 %v3068_v12, %v1648_v11  ;;  %v2145_v12 = vld [vmem:[%s3967_s8 + $0x30] sm:$0xff] }
 0x699   :  { %1719 = vmatmul.mubr.f32.vlgmr.msra.gmra.mrb[4].mxu1 %v1653_v28  ;;  %1790 = vmatmul.mubr.f32.vlgmr.msra.gmra.mrb[24].mxu0 %v1653_v28  ;;  %v2146_v28 = vld [vmem:[%s3967_s8 + $0x38] sm:$0xff] }
 0x69a   :  { %2757 = vmatpush1.bf16.msra.mxu1 %v3509_v31  ;;  %2789 = vmatpush1.bf16.msra.mxu0 %v3512_v36 }
 0x69b   :  { %2759 = vmatprep.subr.bf16.mxu1 %v3517_v39  ;;  %2791 = vmatprep.subr.bf16.mxu0 %v3519_v45 }
 0x69c   :  { %1879 = vmatprep.mubr.f32.mxu1 %v3155_v20  ;;  %1950 = vmatprep.mubr.f32.mxu0 %v3155_v20 }
 0x69e   :  { %2761 = vmatpush1.bf16.msra.mxu1 %v3521_v46  ;;  %2793 = vmatpush1.bf16.msra.mxu0 %v3524_v49 }
 0x69f   :  { %2763 = vmatprep.subr.bf16.mxu1 %v3529_v52  ;;  %2795 = vmatprep.subr.bf16.mxu0 %v3531_v55 }
 0x6a2   :  { %2765 = vmatpush1.bf16.msra.mxu1 %v3533_v56  ;;  %2797 = vmatpush1.bf16.msra.mxu0 %v3536_v58 }
 0x6a3   :  { %2767 = vmatprep.subr.bf16.mxu1 %v3541_v62  ;;  %2799 = vmatprep.subr.bf16.mxu0 %v3543_v2 }
 0x6a6   :  { %2769 = vmatpush1.bf16.msra.mxu1 %v3545_v3  ;;  %2801 = vmatpush1.bf16.msra.mxu0 %v3548_v5 }
 0x6a7   :  { %2771 = vmatprep.subr.bf16.mxu1 %v3553_v16  ;;  %2803 = vmatprep.subr.bf16.mxu0 %v3555_v13 }
 0x6aa   :  { %2773 = vmatpush1.bf16.msra.mxu1 %v3557_v15  ;;  %2805 = vmatpush1.bf16.msra.mxu0 %v3560_v19 }
 0x6ab   :  { %2775 = vmatprep.subr.bf16.mxu1 %v3565_v60  ;;  %2807 = vmatprep.subr.bf16.mxu0 %v3567_v29 }
 0x6ae   :  { %2777 = vmatpush1.bf16.msra.mxu1 %v3569_v30  ;;  %2809 = vmatpush1.bf16.msra.mxu0 %v3572_v37 }
 0x6af   :  { %2779 = vmatprep.subr.bf16.mxu1 %v3577_v42  ;;  %2811 = vmatprep.subr.bf16.mxu0 %v3579_v50 }
 0x6b2   :  { %2781 = vmatpush1.bf16.msra.mxu1 %v3581_v51  ;;  %2813 = vmatpush1.bf16.msra.mxu0 %v3584_v53 }
 0x6b3   :  { %2783 = vmatprep.subr.bf16.mxu1 %v3589_v33  ;;  %2815 = vmatprep.subr.bf16.mxu0 %v3591_v0 }
 0x6b6   :  { %2785 = vmatpush1.bf16.msra.mxu1 %v3593_v1  ;;  %2817 = vmatpush1.bf16.msra.mxu0 %v3596_v7 }
 0x6b7   :  { %2819 = vmatprep.subr.bf16.mxu1 %v3505_v27  ;;  %2851 = vmatprep.subr.bf16.mxu0 %v3507_v44 }
 0x76c   :  { %v1720_v23 = vpop.f32.mrb[4].mxu1  ;;  %v1791_v32 = vpop.f32.mrb[24].mxu0 }
 0x76d   :  { %v2928_v40 = vadd.f32 %v1720_v23, %v3614_v21  ;;  %v1722_v41 = vpop.f32.mrb[5].mxu1  ;;  %v1793_v47 = vpop.f32.mrb[25].mxu0  ;;  %v2942_v8 = vadd.f32 %v1791_v32, %v3626_v34  ;;  %v2892_v23 = vpack.c.bf16 %v2146_v28, %v2145_v12  ;;  %v2147_v32 = vld [vmem:[%s3967_s8 + $0x40] sm:$0xff] }
 0x76e   :  { %v2929_v48 = vadd.f32 %v1722_v41, %v3680_v43  ;;  %v2943_v59 = vadd.f32 %v1793_v47, %v3629_v24  ;;  %v2149_v47 = vld [vmem:[%s3967_s8 + $0x50] sm:$0xff] }
 0x76f   :  { %3069 = vtanh.f32 %v2928_v40  ;;  %v2148_v40 = vld [vmem:[%s3967_s8 + $0x48] sm:$0xff] }
 0x770   :  { %3071 = vtanh.f32 %v2929_v48  ;;  %v2895_v41 = vpack.c.bf16 %v2148_v40, %v2147_v32  ;;  %v2150_v48 = vld [vmem:[%s3967_s8 + $0x58] sm:$0xff] }
 0x771   :  { %3073 = vtanh.f32 %v2942_v8  ;;  %v2898_v8 = vpack.c.bf16 %v2150_v48, %v2149_v47 }
 0x772   :  { %3075 = vtanh.f32 %v2943_v59  ;;  %v2151_v59 = vld [vmem:[%s3967_s8 + $0x60] sm:$0xff] }
 0x779   :  { %v3070_v22 = vpop.eup %3069 }
 0x77a   :  { %v1804_v6 = vmul.f32 0.5, %v3070_v22  ;;  %v3072_v27 = vpop.eup %3071  ;;  %v2152_v22 = vld [vmem:[%s3967_s8 + $0x68] sm:$0xff] }
 0x77b   :  { %v1806_v44 = vmul.f32 0.5, %v3072_v27  ;;  %v3074_v57 = vpop.eup %3073  ;;  %v2153_v27 = vld [vmem:[%s3967_s8 + $0x70] sm:$0xff] }
 0x77c   :  { %v1805_v54 = vadd.f32 0.5, %v1804_v6  ;;  %v3076_v17 = vpop.eup %3075  ;;  %v2901_v6 = vpack.c.bf16 %v2152_v22, %v2151_v59 }
 0x77d   :  { %v1807_v10 = vadd.f32 0.5, %v1806_v44  ;;  %v1808_v35 = vmul.f32 0.5, %v3076_v17 }
 0x77e   :  { %v1811_v61 = vmul.f32 %v3074_v57, %v1805_v54  ;;  %v2154_v54 = vld [vmem:[%s3967_s8 + $0x78] sm:$0xff] }
 0x77f   :  { %v1810_v63 = vmul.f32 %v1807_v10, %v3817_v25  ;;  %v1809_v4 = vadd.f32 0.5, %v1808_v35  ;;  %v2143_v25 = vld [vmem:[%s3967_s8 + $0x20] sm:$0xff]  ;;  %v2904_v44 = vpack.c.bf16 %v2154_v54, %v2153_v27 }
 0x780   :  { %v2889_v11 = vpack.c.bf16 %v2144_v26, %v2143_v25 }
 0x781   :  { %v1812_v9 = vadd.f32 %v1811_v61, %v1810_v63 }
 0x783   :  { %3077 = vtanh.f32 %v1812_v9 }
 0x78d   :  { %v3078_v18 = vpop.eup %3077 }
 0x78e   :  { %v1814_v14 = vmul.f32 %v3078_v18, %v1809_v4 }
 0x790   :  { %1880 = vmatmul.mubr.f32.vlgmr.msra.gmra.mrb[6].mxu1 %v1814_v14  ;;  %1951 = vmatmul.mubr.f32.vlgmr.msra.gmra.mrb[26].mxu0 %v1814_v14 }
 0x791   :  { %2821 = vmatpush1.bf16.msra.mxu1 %v3509_v31  ;;  %2853 = vmatpush1.bf16.msra.mxu0 %v3512_v36 }
 0x792   :  { %2823 = vmatprep.subr.bf16.mxu1 %v3517_v39  ;;  %2855 = vmatprep.subr.bf16.mxu0 %v3519_v45 }
 0x793   :  { %2040 = vmatprep.mubr.f32.mxu1 %v3155_v20  ;;  %2111 = vmatprep.mubr.f32.mxu0 %v3155_v20 }
 0x795   :  { %2825 = vmatpush1.bf16.msra.mxu1 %v3521_v46  ;;  %2857 = vmatpush1.bf16.msra.mxu0 %v3524_v49 }
 0x796   :  { %2827 = vmatprep.subr.bf16.mxu1 %v3529_v52  ;;  %2859 = vmatprep.subr.bf16.mxu0 %v3531_v55 }
 0x799   :  { %2829 = vmatpush1.bf16.msra.mxu1 %v3533_v56  ;;  %2861 = vmatpush1.bf16.msra.mxu0 %v3536_v58 }
 0x79a   :  { %2831 = vmatprep.subr.bf16.mxu1 %v3541_v62  ;;  %2863 = vmatprep.subr.bf16.mxu0 %v3543_v2 }
 0x79d   :  { %2833 = vmatpush1.bf16.msra.mxu1 %v3545_v3  ;;  %2865 = vmatpush1.bf16.msra.mxu0 %v3548_v5 }
 0x79e   :  { %2835 = vmatprep.subr.bf16.mxu1 %v3553_v16  ;;  %2867 = vmatprep.subr.bf16.mxu0 %v3555_v13 }
 0x7a1   :  { %2837 = vmatpush1.bf16.msra.mxu1 %v3557_v15  ;;  %2869 = vmatpush1.bf16.msra.mxu0 %v3560_v19 }
 0x7a2   :  { %2839 = vmatprep.subr.bf16.mxu1 %v3565_v60  ;;  %2871 = vmatprep.subr.bf16.mxu0 %v3567_v29 }
 0x7a5   :  { %2841 = vmatpush1.bf16.msra.mxu1 %v3569_v30  ;;  %2873 = vmatpush1.bf16.msra.mxu0 %v3572_v37 }
 0x7a6   :  { %2843 = vmatprep.subr.bf16.mxu1 %v3577_v42  ;;  %2875 = vmatprep.subr.bf16.mxu0 %v3579_v50  ;;  %v2139_v50 = vld [vmem:[%s3967_s8] sm:$0xff] }
 0x7a9   :  { %2845 = vmatpush1.bf16.msra.mxu1 %v3581_v51  ;;  %2877 = vmatpush1.bf16.msra.mxu0 %v3584_v53  ;;  %v2140_v51 = vld [vmem:[%s3967_s8 + $0x8] sm:$0xff] }
 0x7aa   :  { %2847 = vmatprep.subr.bf16.mxu1 %v3589_v33  ;;  %2879 = vmatprep.subr.bf16.mxu0 %v3591_v0  ;;  %v2883_v53 = vpack.c.bf16 %v2140_v51, %v2139_v50  ;;  %v3156_v33 = vmov 0.0|0.0   ;;  %v2141_v0 = vld [vmem:[%s3967_s8 + $0x10] sm:$0xff] }
 0x7ad   :  { %2849 = vmatpush1.bf16.msra.mxu1 %v3593_v1  ;;  %2881 = vmatpush1.bf16.msra.mxu0 %v3596_v7  ;;  %v2142_v1 = vld [vmem:[%s3967_s8 + $0x18] sm:$0xff] }
 0x7ae   :  { %2882 = vmatprep.subr.bf16.mxu1 %v3156_v33  ;;  %v2886_v7 = vpack.c.bf16 %v2142_v1, %v2141_v0 }
 0x863   :  { %v1881_v31 = vpop.f32.mrb[6].mxu1  ;;  %v1952_v36 = vpop.f32.mrb[26].mxu0 }
 0x864   :  { %v2930_v39 = vadd.f32 %v1881_v31, %v3614_v21  ;;  %v1883_v45 = vpop.f32.mrb[7].mxu1  ;;  %v1954_v46 = vpop.f32.mrb[27].mxu0  ;;  %v2944_v52 = vadd.f32 %v1952_v36, %v3626_v34 }
 0x865   :  { %v2931_v49 = vadd.f32 %v1883_v45, %v3680_v43  ;;  %v2945_v55 = vadd.f32 %v1954_v46, %v3629_v24 }
 0x866   :  { %3079 = vtanh.f32 %v2930_v39 }
 0x867   :  { %3081 = vtanh.f32 %v2931_v49 }
 0x868   :  { %3083 = vtanh.f32 %v2944_v52 }
 0x869   :  { %3085 = vtanh.f32 %v2945_v55 }
 0x870   :  { %v3080_v56 = vpop.eup %3079 }
 0x871   :  { %v1965_v58 = vmul.f32 0.5, %v3080_v56  ;;  %v3082_v62 = vpop.eup %3081 }
 0x872   :  { %v1967_v3 = vmul.f32 0.5, %v3082_v62  ;;  %v3084_v5 = vpop.eup %3083  ;;  %v2284_v62 = vld [vmem:[%s3968_s9] ss:$0 sm:$0xff] }
 0x873   :  { %v1966_v2 = vadd.f32 0.5, %v1965_v58  ;;  %v3086_v60 = vpop.eup %3085 }
 0x874   :  { %v1968_v16 = vadd.f32 0.5, %v1967_v3  ;;  %v1969_v29 = vmul.f32 0.5, %v3086_v60 }
 0x875   :  { %v1972_v13 = vmul.f32 %v3084_v5, %v1966_v2 }
 0x876   :  { %v1971_v15 = vmul.f32 %v1968_v16, %v1812_v9  ;;  %v1970_v30 = vadd.f32 0.5, %v1969_v29 }
 0x878   :  { %v3895_v19 = vadd.f32 %v1972_v13, %v1971_v15 }
 0x87a   :  { %3087 = vtanh.f32 %v3895_v19 }
 0x884   :  { %v3088_v37 = vpop.eup %3087 }
 0x885   :  { %v1975_v42 = vmul.f32 %v3088_v37, %v1970_v30 }
 0x887   :  { %2041 = vmatmul.mubr.f32.vlgmr.msra.gmra.mrb[8].mxu1 %v1975_v42  ;;  %2112 = vmatmul.mubr.f32.vlgmr.msra.gmra.mrb[28].mxu0 %v1975_v42 }
 0x888   :  { %2884 = vmatpush3.bf16.msra.mxu1 %v2883_v53  ;;  %2363 = vmatprep.mubr.msk.f32.mxu1 %vm3157_vm2, %v3155_v20 }
 0x889   :  { %2885 = vmatprep.subr.bf16.mxu1 %v3156_v33 }
 0x88c   :  { %2887 = vmatpush3.bf16.msra.mxu1 %v2886_v7 }
 0x88d   :  { %2888 = vmatprep.subr.bf16.mxu1 %v3156_v33 }
 0x890   :  { %2890 = vmatpush3.bf16.msra.mxu1 %v2889_v11 }
 0x891   :  { %2891 = vmatprep.subr.bf16.mxu1 %v3156_v33 }
 0x894   :  { %2893 = vmatpush3.bf16.msra.mxu1 %v2892_v23 }
 0x895   :  { %2894 = vmatprep.subr.bf16.mxu1 %v3156_v33 }
 0x898   :  { %2896 = vmatpush3.bf16.msra.mxu1 %v2895_v41 }
 0x899   :  { %2897 = vmatprep.subr.bf16.mxu1 %v3156_v33 }
 0x89c   :  { %2899 = vmatpush3.bf16.msra.mxu1 %v2898_v8 }
 0x89d   :  { %2900 = vmatprep.subr.bf16.mxu1 %v3156_v33 }
 0x8a0   :  { %2902 = vmatpush3.bf16.msra.mxu1 %v2901_v6 }
 0x8a1   :  { %2903 = vmatprep.subr.bf16.mxu1 %v3156_v33 }
 0x8a4   :  { %2905 = vmatpush3.bf16.msra.mxu1 %v2904_v44 }
 0x95a   :  { %v2042_v57 = vpop.f32.mrb[8].mxu1  ;;  %v2113_v10 = vpop.f32.mrb[28].mxu0 }
 0x95b   :  { %v2932_v61 = vadd.f32 %v2042_v57, %v3614_v21  ;;  %v2044_v63 = vpop.f32.mrb[9].mxu1  ;;  %v2115_v9 = vpop.f32.mrb[29].mxu0  ;;  %v2946_v35 = vadd.f32 %v2113_v10, %v3626_v34 }
 0x95c   :  { %v2933_v17 = vadd.f32 %v2044_v63, %v3680_v43  ;;  %v2947_v4 = vadd.f32 %v2115_v9, %v3629_v24 }
 0x95d   :  { %3089 = vtanh.f32 %v2932_v61 }
 0x95e   :  { %3091 = vtanh.f32 %v2933_v17 }
 0x95f   :  { %3093 = vtanh.f32 %v2946_v35 }
 0x960   :  { %3095 = vtanh.f32 %v2947_v4 }
 0x967   :  { %v3090_v18 = vpop.eup %3089 }
 0x968   :  { %v2126_v14 = vmul.f32 0.5, %v3090_v18  ;;  %v3092_v31 = vpop.eup %3091 }
 0x969   :  { %v2128_v36 = vmul.f32 0.5, %v3092_v31  ;;  %v3094_v39 = vpop.eup %3093 }
 0x96a   :  { %v2127_v20 = vadd.f32 0.5, %v2126_v14  ;;  %v3096_v43 = vpop.eup %3095 }
 0x96b   :  { %v2129_v45 = vadd.f32 0.5, %v2128_v36  ;;  %v2130_v52 = vmul.f32 0.5, %v3096_v43 }
 0x96c   :  { %v2133_v21 = vmul.f32 %v3094_v39, %v2127_v20 }
 0x96d   :  { %v2132_v46 = vmul.f32 %v2129_v45, %v3895_v19  ;;  %v2131_v34 = vadd.f32 0.5, %v2130_v52 }
 0x96f   :  { %v2134_v49 = vadd.f32 %v2133_v21, %v2132_v46 }
 0x971   :  { %3097 = vtanh.f32 %v2134_v49 }
 0x97b   :  { %v3098_v55 = vpop.eup %3097 }
 0x97c   :  { %v2136_v56 = vmul.f32 %v3098_v55, %v2131_v34 }
 0x97e   :  { %v2137_v24 = vadd.f32 %v2136_v56, %v3676_v38 }
 0x980   :  { %v2138_v58 = vmul.f32 0.5, %v2137_v24 }
 0x982   :  { %2364 = vmatmul.mubr.f32.vlgmr.msra.gmra.mrb[30].mxu1 %v2138_v58 }
 0xa55   :  { %v2228_v2 = vpop.f32.mrb[30].mxu1 }
 0xa56   :  { %v2229_v3 = vadd.f32 %v2284_v62, %v2228_v2  ;;  %v2365_v5 = vpop.f32.mrb[31].mxu1 }
 0xa58   :  { %3099 = vtanh.f32 %v2229_v3 }
 0xa62   :  { %v3100_v16 = vpop.eup %3099 }
 0xa63   :  { %2234 = vst.msk [vmem:[%s3969_s10] sm:$0xff] %vm2233_vm3, %v3100_v16 }
 0xa64   :  { %2239 = vsyncpa [#allocation3], 1 }
 0xa65   :  { %2240 = vsyncpa [#allocation5], 1 }

</bundles_post_ra>
